<compile_context>
chip_gen: v6e
topology: v6e:2x2x1
jax: 0.10.0
libtpu: 0.0.40
codegen_flags: <defaults>
</compile_context>

<pallas_src>
import jax
import jax.numpy as jnp
from jax.experimental import pallas as pl
from jax.experimental.pallas import tpu as pltpu

INPUT_SIZE = 25        # len(features)
HIDDEN_SIZE = 50
OUTPUT_SIZE = 3
NUM_LAYERS = 1         # module uses num_layers=1

LANE = 128
SUBLANE = 8


def _round_up(n, m):
    return ((n + m - 1) // m) * m


def _sigmoid1(v):
    # Exactly one EUP transcendental (tanh); algebraically identical to sigmoid.
    return 0.5 * jnp.tanh(0.5 * v) + 0.5


def lstm_fc_kernel(x_ref, wx_ref, wh_ref, b_ref, wfc_ref, bfc_ref, out_ref, gx_ref):
    """Whole LSTM recurrence + fc head in one kernel invocation.

    x_ref   : (T, B_pad, F_pad)    time-major, zero-padded input
    wx_ref  : (F_pad, 4*H_pad)     W_ih^T, gate order i,f,g,o, zero-padded
    wh_ref  : (H_pad, 4*H_pad)     W_hh^T, zero-padded
    b_ref   : (1, 4*H_pad)         b_ih + b_hh, zero in padded lanes
    wfc_ref : (H_pad, O_pad)       fc weight^T, zero-padded
    bfc_ref : (1, O_pad)
    out_ref : (B_pad, O_pad)
    gx_ref  : (T, B_pad, 4*H_pad)  VMEM scratch for the hoisted input projection
    """
    T, BP, FP = x_ref.shape
    HP = wh_ref.shape[0]

    # --- Hoisted input projection: one (T*BP, FP) @ (FP, 4*HP) matmul with the
    # fused bias folded in, so the recurrence has no per-step bias add. -------
    x_all = x_ref[...].reshape(T * BP, FP)
    gx_ref[...] = (jnp.dot(x_all, wx_ref[...], preferred_element_type=jnp.float32)
                   + b_ref[...]).reshape(T, BP, 4 * HP)

    h0 = jnp.zeros((BP, HP), jnp.float32)
    c0 = jnp.zeros((BP, HP), jnp.float32)

    def step(t, carry):
        h, c = carry
        gates = gx_ref[t] + jnp.dot(h, wh_ref[...],
                                    preferred_element_type=jnp.float32)  # (BP, 4*HP)

        # Lane-aligned 128-wide gate slabs (PyTorch order i, f, g, o).
        i_g = _sigmoid1(gates[:, 0 * HP:1 * HP])
        f_g = _sigmoid1(gates[:, 1 * HP:2 * HP])
        g_g = jnp.tanh(gates[:, 2 * HP:3 * HP])
        o_g = _sigmoid1(gates[:, 3 * HP:4 * HP])

        c_new = f_g * c + i_g * g_g
        h_new = o_g * jnp.tanh(c_new)
        return h_new, c_new

    # Full unroll only for short sequences; bounded unroll keeps LLO scheduling
    # visibility without blowing up vreg live ranges for long T.
    unroll = True if T <= 16 else 8
    h, _ = jax.lax.fori_loop(0, T, step, (h0, c0), unroll=unroll)

    # fc head on the last hidden state; lane-dense (B_pad, O_pad) store.
    out_ref[...] = (jnp.dot(h, wfc_ref[...], preferred_element_type=jnp.float32)
                    + bfc_ref[...])


def init_params(key, input_size=INPUT_SIZE, hidden_size=HIDDEN_SIZE,
                output_size=OUTPUT_SIZE):
    """Raw PyTorch-shaped params (uniform(-1/sqrt(H), 1/sqrt(H)))."""
    ks = jax.random.split(key, 6)
    bound = 1.0 / jnp.sqrt(jnp.float32(hidden_size))
    u = lambda k, shp: jax.random.uniform(k, shp, jnp.float32, -bound, bound)
    return {
        "w_ih": u(ks[0], (4 * hidden_size, input_size)),    # weight_ih_l0
        "w_hh": u(ks[1], (4 * hidden_size, hidden_size)),   # weight_hh_l0
        "b_ih": u(ks[2], (4 * hidden_size,)),
        "b_hh": u(ks[3], (4 * hidden_size,)),
        "w_fc": u(ks[4], (output_size, hidden_size)),       # fc.weight
        "b_fc": u(ks[5], (output_size,)),
    }


def pack_params(raw):
    """Pad to lane-aligned shapes; W_ih^T and W_hh^T kept as separate arrays.

    Each of the 4 gates occupies a 128-wide lane slab; padded rows/cols and the
    padded bias lanes are zero, so padded hidden lanes stay exactly zero through
    the recurrence (i=f=o=0.5, g=0, h0=c0=0) and through the zero-padded fc rows.
    """
    w_ih, w_hh = raw["w_ih"], raw["w_hh"]
    b = raw["b_ih"] + raw["b_hh"]
    w_fc, b_fc = raw["w_fc"], raw["b_fc"]

    H = w_hh.shape[1]
    F = w_ih.shape[1]
    O = w_fc.shape[0]
    FP = _round_up(F, LANE)
    HP = _round_up(H, LANE)
    OP = _round_up(O, LANE)

    w_x = jnp.zeros((FP, 4 * HP), jnp.float32)
    w_h = jnp.zeros((HP, 4 * HP), jnp.float32)
    b_z = jnp.zeros((1, 4 * HP), jnp.float32)
    for g in range(4):  # gate order i, f, g, o (PyTorch)
        w_x = w_x.at[:F, g * HP:g * HP + H].set(w_ih[g * H:(g + 1) * H, :].T)
        w_h = w_h.at[:H, g * HP:g * HP + H].set(w_hh[g * H:(g + 1) * H, :].T)
        b_z = b_z.at[0, g * HP:g * HP + H].set(b[g * H:(g + 1) * H])

    w_fc_p = jnp.zeros((HP, OP), jnp.float32).at[:H, :O].set(w_fc.T)
    b_fc_p = jnp.zeros((1, OP), jnp.float32).at[0, :O].set(b_fc)

    return {"w_x": w_x, "w_h": w_h, "b": b_z, "w_fc": w_fc_p, "b_fc": b_fc_p}


def multi_step_lstm_forward(x, packed, output_size=OUTPUT_SIZE):
    """x: (B, T, F) float32 (batch_first).  Returns (B, output_size)."""
    B, T, F = x.shape
    w_x, w_h, b_z = packed["w_x"], packed["w_h"], packed["b"]
    w_fc, b_fc = packed["w_fc"], packed["b_fc"]

    FP = w_x.shape[0]
    HP = w_h.shape[0]
    OP = w_fc.shape[1]
    BP = max(_round_up(B, SUBLANE), SUBLANE)

    # Time-major, zero-padded layout: one contiguous (BP, FP) slab per step.
    x_p = jnp.zeros((T, BP, FP), jnp.float32)
    x_p = x_p.at[:, :B, :F].set(jnp.transpose(x.astype(jnp.float32), (1, 0, 2)))

    vmem = pl.BlockSpec(memory_space=pltpu.MemorySpace.VMEM)
    out_p = pl.pallas_call(
        lstm_fc_kernel,
        out_shape=jax.ShapeDtypeStruct((BP, OP), jnp.float32),
        # No grid: single invocation, whole arrays resident in VMEM, no
        # double-buffering of the constant weights / input.
        in_specs=[vmem] * 6,
        out_specs=vmem,
        scratch_shapes=[pltpu.VMEM((T, BP, 4 * HP), jnp.float32)],
    )(x_p, w_x, w_h, b_z, w_fc, b_fc)

    return out_p[:B, :output_size]


def reference_forward(x, raw):
    """Pure-JAX reference with the raw (unpadded) PyTorch-shaped params."""
    B, T, F = x.shape
    H = raw["w_hh"].shape[1]
    w_ih_t = raw["w_ih"].T
    w_hh_t = raw["w_hh"].T
    b = (raw["b_ih"] + raw["b_hh"])[None, :]

    def step(carry, x_t):
        h, c = carry
        gates = x_t @ w_ih_t + h @ w_hh_t + b
        i = jax.nn.sigmoid(gates[:, 0 * H:1 * H])
        f = jax.nn.sigmoid(gates[:, 1 * H:2 * H])
        g = jnp.tanh(gates[:, 2 * H:3 * H])
        o = jax.nn.sigmoid(gates[:, 3 * H:4 * H])
        c = f * c + i * g
        h = o * jnp.tanh(c)
        return (h, c), None

    h0 = jnp.zeros((B, H), jnp.float32)
    (h, _), _ = jax.lax.scan(step, (h0, h0), jnp.swapaxes(x, 0, 1))
    return h @ raw["w_fc"].T + raw["b_fc"][None, :]


if __name__ == "__main__":
    key = jax.random.PRNGKey(0)
    k_param, k_x = jax.random.split(key)

    B, T = 2, 8
    x = jax.random.normal(k_x, (B, T, INPUT_SIZE), jnp.float32)

    raw = init_params(k_param)
    packed = pack_params(raw)

    out = multi_step_lstm_forward(x, packed)
    out = jax.block_until_ready(out)

    ref = reference_forward(x, raw)
    assert out.shape == (B, OUTPUT_SIZE)
    assert jnp.allclose(out, ref, atol=1e-4, rtol=1e-4), "mismatch vs JAX reference"

    print("KERNEL_OK")
</pallas_src>

<mosaic_0001>
module attributes {stable_mosaic.version = 11 : i64} {
  func.func @lstm_fc_kernel(%arg0: memref<8x8x128xf32, #tpu.memory_space<vmem>>, %arg1: memref<128x512xf32, #tpu.memory_space<vmem>>, %arg2: memref<128x512xf32, #tpu.memory_space<vmem>>, %arg3: memref<1x512xf32, #tpu.memory_space<vmem>>, %arg4: memref<128x128xf32, #tpu.memory_space<vmem>>, %arg5: memref<1x128xf32, #tpu.memory_space<vmem>>, %arg6: memref<8x128xf32, #tpu.memory_space<vmem>>, %arg7: memref<8x8x512xf32, #tpu.memory_space<vmem>>) attributes {dimension_semantics = [], scalar_prefetch = 0 : i64, scratch_operands = 1 : i64, tpu.core_type = #tpu.core_type<tc>} {
    %c0 = arith.constant 0 : index
    %c0_0 = arith.constant 0 : index
    %c0_1 = arith.constant 0 : index
    %0 = vector.load %arg0[%c0, %c0_0, %c0_1] : memref<8x8x128xf32, #tpu.memory_space<vmem>>, vector<8x8x128xf32>
    %1 = vector.shape_cast %0 : vector<8x8x128xf32> to vector<64x128xf32>
    %c0_2 = arith.constant 0 : index
    %c0_3 = arith.constant 0 : index
    %2 = vector.load %arg1[%c0_2, %c0_3] : memref<128x512xf32, #tpu.memory_space<vmem>>, vector<128x512xf32>
    %cst = arith.constant dense<0.000000e+00> : vector<64x512xf32>
    %3 = tpu.matmul %1, %2, %cst {dimension_numbers = #tpu.dot_dimension_numbers<[1], [0], [0], [1], [0, 0, 1, 1], [], []>} : vector<64x128xf32>, vector<128x512xf32>, vector<64x512xf32> -> vector<64x512xf32>
    %c0_4 = arith.constant 0 : index
    %c0_5 = arith.constant 0 : index
    %4 = vector.load %arg3[%c0_4, %c0_5] : memref<1x512xf32, #tpu.memory_space<vmem>>, vector<1x512xf32>
    %5 = vector.broadcast %4 : vector<1x512xf32> to vector<64x512xf32>
    %6 = arith.addf %3, %5 : vector<64x512xf32>
    %7 = vector.shape_cast %6 : vector<64x512xf32> to vector<8x8x512xf32>
    %c0_6 = arith.constant 0 : index
    %c0_7 = arith.constant 0 : index
    %c0_8 = arith.constant 0 : index
    %8 = vector.load %arg7[%c0_6, %c0_7, %c0_8] : memref<8x8x512xf32, #tpu.memory_space<vmem>>, vector<8x8x512xf32>
    tpu.vector_store %arg7[%c0_6, %c0_7, %c0_8], %7 {strides = array<i32>} : memref<8x8x512xf32, #tpu.memory_space<vmem>>, vector<8x8x512xf32>,
    %cst_9 = arith.constant 0.000000e+00 : f32
    %9 = vector.broadcast %cst_9 : f32 to vector<8x128xf32>
    %cst_10 = arith.constant 0.000000e+00 : f32
    %10 = vector.broadcast %cst_10 : f32 to vector<8x128xf32>
    %c0_i32 = arith.constant 0 : i32
    %11 = arith.index_cast %c0_i32 : i32 to index
    %c0_11 = arith.constant 0 : index
    %c0_12 = arith.constant 0 : index
    %12 = vector.load %arg7[%11, %c0_11, %c0_12] : memref<8x8x512xf32, #tpu.memory_space<vmem>>, vector<1x8x512xf32>
    %13 = vector.shape_cast %12 : vector<1x8x512xf32> to vector<8x512xf32>
    %c0_13 = arith.constant 0 : index
    %c0_14 = arith.constant 0 : index
    %14 = vector.load %arg2[%c0_13, %c0_14] : memref<128x512xf32, #tpu.memory_space<vmem>>, vector<128x512xf32>
    %cst_15 = arith.constant dense<0.000000e+00> : vector<8x512xf32>
    %15 = tpu.matmul %9, %14, %cst_15 {dimension_numbers = #tpu.dot_dimension_numbers<[1], [0], [0], [1], [0, 0, 1, 1], [], []>} : vector<8x128xf32>, vector<128x512xf32>, vector<8x512xf32> -> vector<8x512xf32>
    %16 = arith.addf %13, %15 : vector<8x512xf32>
    %17 = vector.extract_strided_slice %16 {offsets = [0, 0], sizes = [8, 128], strides = [1, 1]} : vector<8x512xf32> to vector<8x128xf32>
    %cst_16 = arith.constant 5.000000e-01 : f32
    %18 = vector.broadcast %cst_16 : f32 to vector<8x128xf32>
    %19 = arith.mulf %18, %17 : vector<8x128xf32>
    %20 = math.tanh %19 : vector<8x128xf32>
    %cst_17 = arith.constant 5.000000e-01 : f32
    %21 = vector.broadcast %cst_17 : f32 to vector<8x128xf32>
    %22 = arith.mulf %21, %20 : vector<8x128xf32>
    %cst_18 = arith.constant 5.000000e-01 : f32
    %23 = vector.broadcast %cst_18 : f32 to vector<8x128xf32>
    %24 = arith.addf %22, %23 : vector<8x128xf32>
    %25 = vector.extract_strided_slice %16 {offsets = [0, 128], sizes = [8, 128], strides = [1, 1]} : vector<8x512xf32> to vector<8x128xf32>
    %cst_19 = arith.constant 5.000000e-01 : f32
    %26 = vector.broadcast %cst_19 : f32 to vector<8x128xf32>
    %27 = arith.mulf %26, %25 : vector<8x128xf32>
    %28 = math.tanh %27 : vector<8x128xf32>
    %cst_20 = arith.constant 5.000000e-01 : f32
    %29 = vector.broadcast %cst_20 : f32 to vector<8x128xf32>
    %30 = arith.mulf %29, %28 : vector<8x128xf32>
    %cst_21 = arith.constant 5.000000e-01 : f32
    %31 = vector.broadcast %cst_21 : f32 to vector<8x128xf32>
    %32 = arith.addf %30, %31 : vector<8x128xf32>
    %33 = vector.extract_strided_slice %16 {offsets = [0, 256], sizes = [8, 128], strides = [1, 1]} : vector<8x512xf32> to vector<8x128xf32>
    %34 = math.tanh %33 : vector<8x128xf32>
    %35 = vector.extract_strided_slice %16 {offsets = [0, 384], sizes = [8, 128], strides = [1, 1]} : vector<8x512xf32> to vector<8x128xf32>
    %cst_22 = arith.constant 5.000000e-01 : f32
    %36 = vector.broadcast %cst_22 : f32 to vector<8x128xf32>
    %37 = arith.mulf %36, %35 : vector<8x128xf32>
    %38 = math.tanh %37 : vector<8x128xf32>
    %cst_23 = arith.constant 5.000000e-01 : f32
    %39 = vector.broadcast %cst_23 : f32 to vector<8x128xf32>
    %40 = arith.mulf %39, %38 : vector<8x128xf32>
    %cst_24 = arith.constant 5.000000e-01 : f32
    %41 = vector.broadcast %cst_24 : f32 to vector<8x128xf32>
    %42 = arith.addf %40, %41 : vector<8x128xf32>
    %43 = arith.mulf %32, %10 : vector<8x128xf32>
    %44 = arith.mulf %24, %34 : vector<8x128xf32>
    %45 = arith.addf %43, %44 : vector<8x128xf32>
    %46 = math.tanh %45 : vector<8x128xf32>
    %47 = arith.mulf %42, %46 : vector<8x128xf32>
    %c1_i32 = arith.constant 1 : i32
    %48 = arith.index_cast %c1_i32 : i32 to index
    %c0_25 = arith.constant 0 : index
    %c0_26 = arith.constant 0 : index
    %49 = vector.load %arg7[%48, %c0_25, %c0_26] : memref<8x8x512xf32, #tpu.memory_space<vmem>>, vector<1x8x512xf32>
    %50 = vector.shape_cast %49 : vector<1x8x512xf32> to vector<8x512xf32>
    %c0_27 = arith.constant 0 : index
    %c0_28 = arith.constant 0 : index
    %51 = vector.load %arg2[%c0_27, %c0_28] : memref<128x512xf32, #tpu.memory_space<vmem>>, vector<128x512xf32>
    %cst_29 = arith.constant dense<0.000000e+00> : vector<8x512xf32>
    %52 = tpu.matmul %47, %51, %cst_29 {dimension_numbers = #tpu.dot_dimension_numbers<[1], [0], [0], [1], [0, 0, 1, 1], [], []>} : vector<8x128xf32>, vector<128x512xf32>, vector<8x512xf32> -> vector<8x512xf32>
    %53 = arith.addf %50, %52 : vector<8x512xf32>
    %54 = vector.extract_strided_slice %53 {offsets = [0, 0], sizes = [8, 128], strides = [1, 1]} : vector<8x512xf32> to vector<8x128xf32>
    %cst_30 = arith.constant 5.000000e-01 : f32
    %55 = vector.broadcast %cst_30 : f32 to vector<8x128xf32>
    %56 = arith.mulf %55, %54 : vector<8x128xf32>
    %57 = math.tanh %56 : vector<8x128xf32>
    %cst_31 = arith.constant 5.000000e-01 : f32
    %58 = vector.broadcast %cst_31 : f32 to vector<8x128xf32>
    %59 = arith.mulf %58, %57 : vector<8x128xf32>
    %cst_32 = arith.constant 5.000000e-01 : f32
    %60 = vector.broadcast %cst_32 : f32 to vector<8x128xf32>
    %61 = arith.addf %59, %60 : vector<8x128xf32>
    %62 = vector.extract_strided_slice %53 {offsets = [0, 128], sizes = [8, 128], strides = [1, 1]} : vector<8x512xf32> to vector<8x128xf32>
    %cst_33 = arith.constant 5.000000e-01 : f32
    %63 = vector.broadcast %cst_33 : f32 to vector<8x128xf32>
    %64 = arith.mulf %63, %62 : vector<8x128xf32>
    %65 = math.tanh %64 : vector<8x128xf32>
    %cst_34 = arith.constant 5.000000e-01 : f32
    %66 = vector.broadcast %cst_34 : f32 to vector<8x128xf32>
    %67 = arith.mulf %66, %65 : vector<8x128xf32>
    %cst_35 = arith.constant 5.000000e-01 : f32
    %68 = vector.broadcast %cst_35 : f32 to vector<8x128xf32>
    %69 = arith.addf %67, %68 : vector<8x128xf32>
    %70 = vector.extract_strided_slice %53 {offsets = [0, 256], sizes = [8, 128], strides = [1, 1]} : vector<8x512xf32> to vector<8x128xf32>
    %71 = math.tanh %70 : vector<8x128xf32>
    %72 = vector.extract_strided_slice %53 {offsets = [0, 384], sizes = [8, 128], strides = [1, 1]} : vector<8x512xf32> to vector<8x128xf32>
    %cst_36 = arith.constant 5.000000e-01 : f32
    %73 = vector.broadcast %cst_36 : f32 to vector<8x128xf32>
    %74 = arith.mulf %73, %72 : vector<8x128xf32>
    %75 = math.tanh %74 : vector<8x128xf32>
    %cst_37 = arith.constant 5.000000e-01 : f32
    %76 = vector.broadcast %cst_37 : f32 to vector<8x128xf32>
    %77 = arith.mulf %76, %75 : vector<8x128xf32>
    %cst_38 = arith.constant 5.000000e-01 : f32
    %78 = vector.broadcast %cst_38 : f32 to vector<8x128xf32>
    %79 = arith.addf %77, %78 : vector<8x128xf32>
    %80 = arith.mulf %69, %45 : vector<8x128xf32>
    %81 = arith.mulf %61, %71 : vector<8x128xf32>
    %82 = arith.addf %80, %81 : vector<8x128xf32>
    %83 = math.tanh %82 : vector<8x128xf32>
    %84 = arith.mulf %79, %83 : vector<8x128xf32>
    %c2_i32 = arith.constant 2 : i32
    %85 = arith.index_cast %c2_i32 : i32 to index
    %c0_39 = arith.constant 0 : index
    %c0_40 = arith.constant 0 : index
    %86 = vector.load %arg7[%85, %c0_39, %c0_40] : memref<8x8x512xf32, #tpu.memory_space<vmem>>, vector<1x8x512xf32>
    %87 = vector.shape_cast %86 : vector<1x8x512xf32> to vector<8x512xf32>
    %c0_41 = arith.constant 0 : index
    %c0_42 = arith.constant 0 : index
    %88 = vector.load %arg2[%c0_41, %c0_42] : memref<128x512xf32, #tpu.memory_space<vmem>>, vector<128x512xf32>
    %cst_43 = arith.constant dense<0.000000e+00> : vector<8x512xf32>
    %89 = tpu.matmul %84, %88, %cst_43 {dimension_numbers = #tpu.dot_dimension_numbers<[1], [0], [0], [1], [0, 0, 1, 1], [], []>} : vector<8x128xf32>, vector<128x512xf32>, vector<8x512xf32> -> vector<8x512xf32>
    %90 = arith.addf %87, %89 : vector<8x512xf32>
    %91 = vector.extract_strided_slice %90 {offsets = [0, 0], sizes = [8, 128], strides = [1, 1]} : vector<8x512xf32> to vector<8x128xf32>
    %cst_44 = arith.constant 5.000000e-01 : f32
    %92 = vector.broadcast %cst_44 : f32 to vector<8x128xf32>
    %93 = arith.mulf %92, %91 : vector<8x128xf32>
    %94 = math.tanh %93 : vector<8x128xf32>
    %cst_45 = arith.constant 5.000000e-01 : f32
    %95 = vector.broadcast %cst_45 : f32 to vector<8x128xf32>
    %96 = arith.mulf %95, %94 : vector<8x128xf32>
    %cst_46 = arith.constant 5.000000e-01 : f32
    %97 = vector.broadcast %cst_46 : f32 to vector<8x128xf32>
    %98 = arith.addf %96, %97 : vector<8x128xf32>
    %99 = vector.extract_strided_slice %90 {offsets = [0, 128], sizes = [8, 128], strides = [1, 1]} : vector<8x512xf32> to vector<8x128xf32>
    %cst_47 = arith.constant 5.000000e-01 : f32
    %100 = vector.broadcast %cst_47 : f32 to vector<8x128xf32>
    %101 = arith.mulf %100, %99 : vector<8x128xf32>
    %102 = math.tanh %101 : vector<8x128xf32>
    %cst_48 = arith.constant 5.000000e-01 : f32
    %103 = vector.broadcast %cst_48 : f32 to vector<8x128xf32>
    %104 = arith.mulf %103, %102 : vector<8x128xf32>
    %cst_49 = arith.constant 5.000000e-01 : f32
    %105 = vector.broadcast %cst_49 : f32 to vector<8x128xf32>
    %106 = arith.addf %104, %105 : vector<8x128xf32>
    %107 = vector.extract_strided_slice %90 {offsets = [0, 256], sizes = [8, 128], strides = [1, 1]} : vector<8x512xf32> to vector<8x128xf32>
    %108 = math.tanh %107 : vector<8x128xf32>
    %109 = vector.extract_strided_slice %90 {offsets = [0, 384], sizes = [8, 128], strides = [1, 1]} : vector<8x512xf32> to vector<8x128xf32>
    %cst_50 = arith.constant 5.000000e-01 : f32
    %110 = vector.broadcast %cst_50 : f32 to vector<8x128xf32>
    %111 = arith.mulf %110, %109 : vector<8x128xf32>
    %112 = math.tanh %111 : vector<8x128xf32>
    %cst_51 = arith.constant 5.000000e-01 : f32
    %113 = vector.broadcast %cst_51 : f32 to vector<8x128xf32>
    %114 = arith.mulf %113, %112 : vector<8x128xf32>
    %cst_52 = arith.constant 5.000000e-01 : f32
    %115 = vector.broadcast %cst_52 : f32 to vector<8x128xf32>
    %116 = arith.addf %114, %115 : vector<8x128xf32>
    %117 = arith.mulf %106, %82 : vector<8x128xf32>
    %118 = arith.mulf %98, %108 : vector<8x128xf32>
    %119 = arith.addf %117, %118 : vector<8x128xf32>
    %120 = math.tanh %119 : vector<8x128xf32>
    %121 = arith.mulf %116, %120 : vector<8x128xf32>
    %c3_i32 = arith.constant 3 : i32
    %122 = arith.index_cast %c3_i32 : i32 to index
    %c0_53 = arith.constant 0 : index
    %c0_54 = arith.constant 0 : index
    %123 = vector.load %arg7[%122, %c0_53, %c0_54] : memref<8x8x512xf32, #tpu.memory_space<vmem>>, vector<1x8x512xf32>
    %124 = vector.shape_cast %123 : vector<1x8x512xf32> to vector<8x512xf32>
    %c0_55 = arith.constant 0 : index
    %c0_56 = arith.constant 0 : index
    %125 = vector.load %arg2[%c0_55, %c0_56] : memref<128x512xf32, #tpu.memory_space<vmem>>, vector<128x512xf32>
    %cst_57 = arith.constant dense<0.000000e+00> : vector<8x512xf32>
    %126 = tpu.matmul %121, %125, %cst_57 {dimension_numbers = #tpu.dot_dimension_numbers<[1], [0], [0], [1], [0, 0, 1, 1], [], []>} : vector<8x128xf32>, vector<128x512xf32>, vector<8x512xf32> -> vector<8x512xf32>
    %127 = arith.addf %124, %126 : vector<8x512xf32>
    %128 = vector.extract_strided_slice %127 {offsets = [0, 0], sizes = [8, 128], strides = [1, 1]} : vector<8x512xf32> to vector<8x128xf32>
    %cst_58 = arith.constant 5.000000e-01 : f32
    %129 = vector.broadcast %cst_58 : f32 to vector<8x128xf32>
    %130 = arith.mulf %129, %128 : vector<8x128xf32>
    %131 = math.tanh %130 : vector<8x128xf32>
    %cst_59 = arith.constant 5.000000e-01 : f32
    %132 = vector.broadcast %cst_59 : f32 to vector<8x128xf32>
    %133 = arith.mulf %132, %131 : vector<8x128xf32>
    %cst_60 = arith.constant 5.000000e-01 : f32
    %134 = vector.broadcast %cst_60 : f32 to vector<8x128xf32>
    %135 = arith.addf %133, %134 : vector<8x128xf32>
    %136 = vector.extract_strided_slice %127 {offsets = [0, 128], sizes = [8, 128], strides = [1, 1]} : vector<8x512xf32> to vector<8x128xf32>
    %cst_61 = arith.constant 5.000000e-01 : f32
    %137 = vector.broadcast %cst_61 : f32 to vector<8x128xf32>
    %138 = arith.mulf %137, %136 : vector<8x128xf32>
    %139 = math.tanh %138 : vector<8x128xf32>
    %cst_62 = arith.constant 5.000000e-01 : f32
    %140 = vector.broadcast %cst_62 : f32 to vector<8x128xf32>
    %141 = arith.mulf %140, %139 : vector<8x128xf32>
    %cst_63 = arith.constant 5.000000e-01 : f32
    %142 = vector.broadcast %cst_63 : f32 to vector<8x128xf32>
    %143 = arith.addf %141, %142 : vector<8x128xf32>
    %144 = vector.extract_strided_slice %127 {offsets = [0, 256], sizes = [8, 128], strides = [1, 1]} : vector<8x512xf32> to vector<8x128xf32>
    %145 = math.tanh %144 : vector<8x128xf32>
    %146 = vector.extract_strided_slice %127 {offsets = [0, 384], sizes = [8, 128], strides = [1, 1]} : vector<8x512xf32> to vector<8x128xf32>
    %cst_64 = arith.constant 5.000000e-01 : f32
    %147 = vector.broadcast %cst_64 : f32 to vector<8x128xf32>
    %148 = arith.mulf %147, %146 : vector<8x128xf32>
    %149 = math.tanh %148 : vector<8x128xf32>
    %cst_65 = arith.constant 5.000000e-01 : f32
    %150 = vector.broadcast %cst_65 : f32 to vector<8x128xf32>
    %151 = arith.mulf %150, %149 : vector<8x128xf32>
    %cst_66 = arith.constant 5.000000e-01 : f32
    %152 = vector.broadcast %cst_66 : f32 to vector<8x128xf32>
    %153 = arith.addf %151, %152 : vector<8x128xf32>
    %154 = arith.mulf %143, %119 : vector<8x128xf32>
    %155 = arith.mulf %135, %145 : vector<8x128xf32>
    %156 = arith.addf %154, %155 : vector<8x128xf32>
    %157 = math.tanh %156 : vector<8x128xf32>
    %158 = arith.mulf %153, %157 : vector<8x128xf32>
    %c4_i32 = arith.constant 4 : i32
    %159 = arith.index_cast %c4_i32 : i32 to index
    %c0_67 = arith.constant 0 : index
    %c0_68 = arith.constant 0 : index
    %160 = vector.load %arg7[%159, %c0_67, %c0_68] : memref<8x8x512xf32, #tpu.memory_space<vmem>>, vector<1x8x512xf32>
    %161 = vector.shape_cast %160 : vector<1x8x512xf32> to vector<8x512xf32>
    %c0_69 = arith.constant 0 : index
    %c0_70 = arith.constant 0 : index
    %162 = vector.load %arg2[%c0_69, %c0_70] : memref<128x512xf32, #tpu.memory_space<vmem>>, vector<128x512xf32>
    %cst_71 = arith.constant dense<0.000000e+00> : vector<8x512xf32>
    %163 = tpu.matmul %158, %162, %cst_71 {dimension_numbers = #tpu.dot_dimension_numbers<[1], [0], [0], [1], [0, 0, 1, 1], [], []>} : vector<8x128xf32>, vector<128x512xf32>, vector<8x512xf32> -> vector<8x512xf32>
    %164 = arith.addf %161, %163 : vector<8x512xf32>
    %165 = vector.extract_strided_slice %164 {offsets = [0, 0], sizes = [8, 128], strides = [1, 1]} : vector<8x512xf32> to vector<8x128xf32>
    %cst_72 = arith.constant 5.000000e-01 : f32
    %166 = vector.broadcast %cst_72 : f32 to vector<8x128xf32>
    %167 = arith.mulf %166, %165 : vector<8x128xf32>
    %168 = math.tanh %167 : vector<8x128xf32>
    %cst_73 = arith.constant 5.000000e-01 : f32
    %169 = vector.broadcast %cst_73 : f32 to vector<8x128xf32>
    %170 = arith.mulf %169, %168 : vector<8x128xf32>
    %cst_74 = arith.constant 5.000000e-01 : f32
    %171 = vector.broadcast %cst_74 : f32 to vector<8x128xf32>
    %172 = arith.addf %170, %171 : vector<8x128xf32>
    %173 = vector.extract_strided_slice %164 {offsets = [0, 128], sizes = [8, 128], strides = [1, 1]} : vector<8x512xf32> to vector<8x128xf32>
    %cst_75 = arith.constant 5.000000e-01 : f32
    %174 = vector.broadcast %cst_75 : f32 to vector<8x128xf32>
    %175 = arith.mulf %174, %173 : vector<8x128xf32>
    %176 = math.tanh %175 : vector<8x128xf32>
    %cst_76 = arith.constant 5.000000e-01 : f32
    %177 = vector.broadcast %cst_76 : f32 to vector<8x128xf32>
    %178 = arith.mulf %177, %176 : vector<8x128xf32>
    %cst_77 = arith.constant 5.000000e-01 : f32
    %179 = vector.broadcast %cst_77 : f32 to vector<8x128xf32>
    %180 = arith.addf %178, %179 : vector<8x128xf32>
    %181 = vector.extract_strided_slice %164 {offsets = [0, 256], sizes = [8, 128], strides = [1, 1]} : vector<8x512xf32> to vector<8x128xf32>
    %182 = math.tanh %181 : vector<8x128xf32>
    %183 = vector.extract_strided_slice %164 {offsets = [0, 384], sizes = [8, 128], strides = [1, 1]} : vector<8x512xf32> to vector<8x128xf32>
    %cst_78 = arith.constant 5.000000e-01 : f32
    %184 = vector.broadcast %cst_78 : f32 to vector<8x128xf32>
    %185 = arith.mulf %184, %183 : vector<8x128xf32>
    %186 = math.tanh %185 : vector<8x128xf32>
    %cst_79 = arith.constant 5.000000e-01 : f32
    %187 = vector.broadcast %cst_79 : f32 to vector<8x128xf32>
    %188 = arith.mulf %187, %186 : vector<8x128xf32>
    %cst_80 = arith.constant 5.000000e-01 : f32
    %189 = vector.broadcast %cst_80 : f32 to vector<8x128xf32>
    %190 = arith.addf %188, %189 : vector<8x128xf32>
    %191 = arith.mulf %180, %156 : vector<8x128xf32>
    %192 = arith.mulf %172, %182 : vector<8x128xf32>
    %193 = arith.addf %191, %192 : vector<8x128xf32>
    %194 = math.tanh %193 : vector<8x128xf32>
    %195 = arith.mulf %190, %194 : vector<8x128xf32>
    %c5_i32 = arith.constant 5 : i32
    %196 = arith.index_cast %c5_i32 : i32 to index
    %c0_81 = arith.constant 0 : index
    %c0_82 = arith.constant 0 : index
    %197 = vector.load %arg7[%196, %c0_81, %c0_82] : memref<8x8x512xf32, #tpu.memory_space<vmem>>, vector<1x8x512xf32>
    %198 = vector.shape_cast %197 : vector<1x8x512xf32> to vector<8x512xf32>
    %c0_83 = arith.constant 0 : index
    %c0_84 = arith.constant 0 : index
    %199 = vector.load %arg2[%c0_83, %c0_84] : memref<128x512xf32, #tpu.memory_space<vmem>>, vector<128x512xf32>
    %cst_85 = arith.constant dense<0.000000e+00> : vector<8x512xf32>
    %200 = tpu.matmul %195, %199, %cst_85 {dimension_numbers = #tpu.dot_dimension_numbers<[1], [0], [0], [1], [0, 0, 1, 1], [], []>} : vector<8x128xf32>, vector<128x512xf32>, vector<8x512xf32> -> vector<8x512xf32>
    %201 = arith.addf %198, %200 : vector<8x512xf32>
    %202 = vector.extract_strided_slice %201 {offsets = [0, 0], sizes = [8, 128], strides = [1, 1]} : vector<8x512xf32> to vector<8x128xf32>
    %cst_86 = arith.constant 5.000000e-01 : f32
    %203 = vector.broadcast %cst_86 : f32 to vector<8x128xf32>
    %204 = arith.mulf %203, %202 : vector<8x128xf32>
    %205 = math.tanh %204 : vector<8x128xf32>
    %cst_87 = arith.constant 5.000000e-01 : f32
    %206 = vector.broadcast %cst_87 : f32 to vector<8x128xf32>
    %207 = arith.mulf %206, %205 : vector<8x128xf32>
    %cst_88 = arith.constant 5.000000e-01 : f32
    %208 = vector.broadcast %cst_88 : f32 to vector<8x128xf32>
    %209 = arith.addf %207, %208 : vector<8x128xf32>
    %210 = vector.extract_strided_slice %201 {offsets = [0, 128], sizes = [8, 128], strides = [1, 1]} : vector<8x512xf32> to vector<8x128xf32>
    %cst_89 = arith.constant 5.000000e-01 : f32
    %211 = vector.broadcast %cst_89 : f32 to vector<8x128xf32>
    %212 = arith.mulf %211, %210 : vector<8x128xf32>
    %213 = math.tanh %212 : vector<8x128xf32>
    %cst_90 = arith.constant 5.000000e-01 : f32
    %214 = vector.broadcast %cst_90 : f32 to vector<8x128xf32>
    %215 = arith.mulf %214, %213 : vector<8x128xf32>
    %cst_91 = arith.constant 5.000000e-01 : f32
    %216 = vector.broadcast %cst_91 : f32 to vector<8x128xf32>
    %217 = arith.addf %215, %216 : vector<8x128xf32>
    %218 = vector.extract_strided_slice %201 {offsets = [0, 256], sizes = [8, 128], strides = [1, 1]} : vector<8x512xf32> to vector<8x128xf32>
    %219 = math.tanh %218 : vector<8x128xf32>
    %220 = vector.extract_strided_slice %201 {offsets = [0, 384], sizes = [8, 128], strides = [1, 1]} : vector<8x512xf32> to vector<8x128xf32>
    %cst_92 = arith.constant 5.000000e-01 : f32
    %221 = vector.broadcast %cst_92 : f32 to vector<8x128xf32>
    %222 = arith.mulf %221, %220 : vector<8x128xf32>
    %223 = math.tanh %222 : vector<8x128xf32>
    %cst_93 = arith.constant 5.000000e-01 : f32
    %224 = vector.broadcast %cst_93 : f32 to vector<8x128xf32>
    %225 = arith.mulf %224, %223 : vector<8x128xf32>
    %cst_94 = arith.constant 5.000000e-01 : f32
    %226 = vector.broadcast %cst_94 : f32 to vector<8x128xf32>
    %227 = arith.addf %225, %226 : vector<8x128xf32>
    %228 = arith.mulf %217, %193 : vector<8x128xf32>
    %229 = arith.mulf %209, %219 : vector<8x128xf32>
    %230 = arith.addf %228, %229 : vector<8x128xf32>
    %231 = math.tanh %230 : vector<8x128xf32>
    %232 = arith.mulf %227, %231 : vector<8x128xf32>
    %c6_i32 = arith.constant 6 : i32
    %233 = arith.index_cast %c6_i32 : i32 to index
    %c0_95 = arith.constant 0 : index
    %c0_96 = arith.constant 0 : index
    %234 = vector.load %arg7[%233, %c0_95, %c0_96] : memref<8x8x512xf32, #tpu.memory_space<vmem>>, vector<1x8x512xf32>
    %235 = vector.shape_cast %234 : vector<1x8x512xf32> to vector<8x512xf32>
    %c0_97 = arith.constant 0 : index
    %c0_98 = arith.constant 0 : index
    %236 = vector.load %arg2[%c0_97, %c0_98] : memref<128x512xf32, #tpu.memory_space<vmem>>, vector<128x512xf32>
    %cst_99 = arith.constant dense<0.000000e+00> : vector<8x512xf32>
    %237 = tpu.matmul %232, %236, %cst_99 {dimension_numbers = #tpu.dot_dimension_numbers<[1], [0], [0], [1], [0, 0, 1, 1], [], []>} : vector<8x128xf32>, vector<128x512xf32>, vector<8x512xf32> -> vector<8x512xf32>
    %238 = arith.addf %235, %237 : vector<8x512xf32>
    %239 = vector.extract_strided_slice %238 {offsets = [0, 0], sizes = [8, 128], strides = [1, 1]} : vector<8x512xf32> to vector<8x128xf32>
    %cst_100 = arith.constant 5.000000e-01 : f32
    %240 = vector.broadcast %cst_100 : f32 to vector<8x128xf32>
    %241 = arith.mulf %240, %239 : vector<8x128xf32>
    %242 = math.tanh %241 : vector<8x128xf32>
    %cst_101 = arith.constant 5.000000e-01 : f32
    %243 = vector.broadcast %cst_101 : f32 to vector<8x128xf32>
    %244 = arith.mulf %243, %242 : vector<8x128xf32>
    %cst_102 = arith.constant 5.000000e-01 : f32
    %245 = vector.broadcast %cst_102 : f32 to vector<8x128xf32>
    %246 = arith.addf %244, %245 : vector<8x128xf32>
    %247 = vector.extract_strided_slice %238 {offsets = [0, 128], sizes = [8, 128], strides = [1, 1]} : vector<8x512xf32> to vector<8x128xf32>
    %cst_103 = arith.constant 5.000000e-01 : f32
    %248 = vector.broadcast %cst_103 : f32 to vector<8x128xf32>
    %249 = arith.mulf %248, %247 : vector<8x128xf32>
    %250 = math.tanh %249 : vector<8x128xf32>
    %cst_104 = arith.constant 5.000000e-01 : f32
    %251 = vector.broadcast %cst_104 : f32 to vector<8x128xf32>
    %252 = arith.mulf %251, %250 : vector<8x128xf32>
    %cst_105 = arith.constant 5.000000e-01 : f32
    %253 = vector.broadcast %cst_105 : f32 to vector<8x128xf32>
    %254 = arith.addf %252, %253 : vector<8x128xf32>
    %255 = vector.extract_strided_slice %238 {offsets = [0, 256], sizes = [8, 128], strides = [1, 1]} : vector<8x512xf32> to vector<8x128xf32>
    %256 = math.tanh %255 : vector<8x128xf32>
    %257 = vector.extract_strided_slice %238 {offsets = [0, 384], sizes = [8, 128], strides = [1, 1]} : vector<8x512xf32> to vector<8x128xf32>
    %cst_106 = arith.constant 5.000000e-01 : f32
    %258 = vector.broadcast %cst_106 : f32 to vector<8x128xf32>
    %259 = arith.mulf %258, %257 : vector<8x128xf32>
    %260 = math.tanh %259 : vector<8x128xf32>
    %cst_107 = arith.constant 5.000000e-01 : f32
    %261 = vector.broadcast %cst_107 : f32 to vector<8x128xf32>
    %262 = arith.mulf %261, %260 : vector<8x128xf32>
    %cst_108 = arith.constant 5.000000e-01 : f32
    %263 = vector.broadcast %cst_108 : f32 to vector<8x128xf32>
    %264 = arith.addf %262, %263 : vector<8x128xf32>
    %265 = arith.mulf %254, %230 : vector<8x128xf32>
    %266 = arith.mulf %246, %256 : vector<8x128xf32>
    %267 = arith.addf %265, %266 : vector<8x128xf32>
    %268 = math.tanh %267 : vector<8x128xf32>
    %269 = arith.mulf %264, %268 : vector<8x128xf32>
    %c7_i32 = arith.constant 7 : i32
    %270 = arith.index_cast %c7_i32 : i32 to index
    %c0_109 = arith.constant 0 : index
    %c0_110 = arith.constant 0 : index
    %271 = vector.load %arg7[%270, %c0_109, %c0_110] : memref<8x8x512xf32, #tpu.memory_space<vmem>>, vector<1x8x512xf32>
    %272 = vector.shape_cast %271 : vector<1x8x512xf32> to vector<8x512xf32>
    %c0_111 = arith.constant 0 : index
    %c0_112 = arith.constant 0 : index
    %273 = vector.load %arg2[%c0_111, %c0_112] : memref<128x512xf32, #tpu.memory_space<vmem>>, vector<128x512xf32>
    %cst_113 = arith.constant dense<0.000000e+00> : vector<8x512xf32>
    %274 = tpu.matmul %269, %273, %cst_113 {dimension_numbers = #tpu.dot_dimension_numbers<[1], [0], [0], [1], [0, 0, 1, 1], [], []>} : vector<8x128xf32>, vector<128x512xf32>, vector<8x512xf32> -> vector<8x512xf32>
    %275 = arith.addf %272, %274 : vector<8x512xf32>
    %276 = vector.extract_strided_slice %275 {offsets = [0, 0], sizes = [8, 128], strides = [1, 1]} : vector<8x512xf32> to vector<8x128xf32>
    %cst_114 = arith.constant 5.000000e-01 : f32
    %277 = vector.broadcast %cst_114 : f32 to vector<8x128xf32>
    %278 = arith.mulf %277, %276 : vector<8x128xf32>
    %279 = math.tanh %278 : vector<8x128xf32>
    %cst_115 = arith.constant 5.000000e-01 : f32
    %280 = vector.broadcast %cst_115 : f32 to vector<8x128xf32>
    %281 = arith.mulf %280, %279 : vector<8x128xf32>
    %cst_116 = arith.constant 5.000000e-01 : f32
    %282 = vector.broadcast %cst_116 : f32 to vector<8x128xf32>
    %283 = arith.addf %281, %282 : vector<8x128xf32>
    %284 = vector.extract_strided_slice %275 {offsets = [0, 128], sizes = [8, 128], strides = [1, 1]} : vector<8x512xf32> to vector<8x128xf32>
    %cst_117 = arith.constant 5.000000e-01 : f32
    %285 = vector.broadcast %cst_117 : f32 to vector<8x128xf32>
    %286 = arith.mulf %285, %284 : vector<8x128xf32>
    %287 = math.tanh %286 : vector<8x128xf32>
    %cst_118 = arith.constant 5.000000e-01 : f32
    %288 = vector.broadcast %cst_118 : f32 to vector<8x128xf32>
    %289 = arith.mulf %288, %287 : vector<8x128xf32>
    %cst_119 = arith.constant 5.000000e-01 : f32
    %290 = vector.broadcast %cst_119 : f32 to vector<8x128xf32>
    %291 = arith.addf %289, %290 : vector<8x128xf32>
    %292 = vector.extract_strided_slice %275 {offsets = [0, 256], sizes = [8, 128], strides = [1, 1]} : vector<8x512xf32> to vector<8x128xf32>
    %293 = math.tanh %292 : vector<8x128xf32>
    %294 = vector.extract_strided_slice %275 {offsets = [0, 384], sizes = [8, 128], strides = [1, 1]} : vector<8x512xf32> to vector<8x128xf32>
    %cst_120 = arith.constant 5.000000e-01 : f32
    %295 = vector.broadcast %cst_120 : f32 to vector<8x128xf32>
    %296 = arith.mulf %295, %294 : vector<8x128xf32>
    %297 = math.tanh %296 : vector<8x128xf32>
    %cst_121 = arith.constant 5.000000e-01 : f32
    %298 = vector.broadcast %cst_121 : f32 to vector<8x128xf32>
    %299 = arith.mulf %298, %297 : vector<8x128xf32>
    %cst_122 = arith.constant 5.000000e-01 : f32
    %300 = vector.broadcast %cst_122 : f32 to vector<8x128xf32>
    %301 = arith.addf %299, %300 : vector<8x128xf32>
    %302 = arith.mulf %291, %267 : vector<8x128xf32>
    %303 = arith.mulf %283, %293 : vector<8x128xf32>
    %304 = arith.addf %302, %303 : vector<8x128xf32>
    %305 = math.tanh %304 : vector<8x128xf32>
    %306 = arith.mulf %301, %305 : vector<8x128xf32>
    %c8_i32 = arith.constant 8 : i32
    %c0_123 = arith.constant 0 : index
    %c0_124 = arith.constant 0 : index
    %307 = vector.load %arg4[%c0_123, %c0_124] : memref<128x128xf32, #tpu.memory_space<vmem>>, vector<128x128xf32>
    %cst_125 = arith.constant dense<0.000000e+00> : vector<8x128xf32>
    %308 = tpu.matmul %306, %307, %cst_125 {dimension_numbers = #tpu.dot_dimension_numbers<[1], [0], [0], [1], [0, 0, 1, 1], [], []>} : vector<8x128xf32>, vector<128x128xf32>, vector<8x128xf32> -> vector<8x128xf32>
    %c0_126 = arith.constant 0 : index
    %c0_127 = arith.constant 0 : index
    %309 = vector.load %arg5[%c0_126, %c0_127] : memref<1x128xf32, #tpu.memory_space<vmem>>, vector<1x128xf32>
    %310 = vector.broadcast %309 : vector<1x128xf32> to vector<8x128xf32>
    %311 = arith.addf %308, %310 : vector<8x128xf32>
    %c0_128 = arith.constant 0 : index
    %c0_129 = arith.constant 0 : index
    %312 = vector.load %arg6[%c0_128, %c0_129] : memref<8x128xf32, #tpu.memory_space<vmem>>, vector<8x128xf32>
    tpu.vector_store %arg6[%c0_128, %c0_129], %311 {strides = array<i32>} : memref<8x128xf32, #tpu.memory_space<vmem>>, vector<8x128xf32>,
    return
  }
}

</mosaic_0001>

<bundles_post_ra>
// kernel: tpu_custom_call.1
= control target key start
LH: loop header
LB: loop body
LE: loop exit
PB: predicated region body
PF: predicated region fallthrough
CT: control target
= control target key end

     0   :  { %11 = vsyncpa [#allocation4], 0  ;;  %s3309_s0 = inlined_call_operand.hbm [shape: f32[8,8,128], index: 0, kind: input, shape index: {}]   ;;  %s3310_s1 = inlined_call_operand.hbm [shape: f32[128,512], index: 1, kind: input, shape index: {}]   ;;  %s3311_s2 = inlined_call_operand.hbm [shape: f32[128,512], index: 2, kind: input, shape index: {}]   ;;  %s3312_s3 = inlined_call_operand.vmem [shape: f32[1,512], index: 3, kind: input, shape index: {}]   ;;  %s3313_s4 = inlined_call_operand.hbm [shape: f32[128,128], index: 4, kind: input, shape index: {}]   ;;  %s3314_s5 = inlined_call_operand.vmem [shape: f32[1,128], index: 5, kind: input, shape index: {}]   ;;  %s3315_s6 = inlined_call_operand.hbm [shape: f32[8,128], index: 6, kind: output, shape index: {}]  }
   0x1   :  { %12 = vsyncpa [#allocation7], 0 }
   0x2   :  { %13 = vsyncpa [#allocation10], 0 }
   0x3   :  { %14 = vsyncpa [#allocation5], 0  ;;  %s2273_s21 = smov [#allocation6]  }
   0x4   :  { %s32_s22 = sshll.u32 %s2273_s21, 4  ;;  %s33_s22 = int_to_ptr.vmem [resolvable:$true] %s32_s22 }
   0x5   :  { %s2173_s23 = scalar_lea.vmem %s33_s22, 8192  ;;  %p2178_p1 = scmp.lt.s32.totalorder %s33_s22, %s33_s22 }
   0x6   :  { %p2174_p0 = scmp.ne.s32.totalorder %s33_s22, %s2173_s23  ;;  %p2179_p2 = scmp.lt.s32.totalorder %s2173_s23, %s2173_s23 }
   0x8   :  { %p2180_p3 = por %p2179_p2, %p2178_p1 }
   0xa   :  { %p2181_p4 = pnand %p2180_p3, %p2174_p0 }
   0xc   :  { %2184 = shalt.err (!%p2181_p4)
}
   0xd   :  { %s2274_s24 = smov 512   ;;  %s2275_s25 = smov 32  }
   0xe   :  { %38 = dma.hbm_to_vmem [thread:$0]  %s3310_s1, 8192, %s33_s22, [#allocation7], %s2274_s24, %s2274_s24, %s2275_s25  }
   0xf   :  { %s2276_s28 = smov [#allocation3]  }
  0x10   :  { %s20_s29 = sshll.u32 %s2276_s28, 4  ;;  %s21_s29 = int_to_ptr.vmem [resolvable:$true] %s20_s29 }
  0x11   :  { %s2193_s30 = scalar_lea.vmem %s21_s29, 1024  ;;  %p2198_p6 = scmp.lt.s32.totalorder %s21_s29, %s21_s29 }
  0x12   :  { %p2194_p5 = scmp.ne.s32.totalorder %s21_s29, %s2193_s30  ;;  %p2199_p7 = scmp.lt.s32.totalorder %s2193_s30, %s2193_s30 }
  0x14   :  { %p2200_p8 = por %p2199_p7, %p2198_p6 }
  0x16   :  { %p2201_p9 = pnand %p2200_p8, %p2194_p5 }
  0x18   :  { %2204 = shalt.err (!%p2201_p9)
}
  0x19   :  { %s2277_s7 = smov 128   ;;  %s2278_s8 = smov 8  }
  0x1a   :  { %26 = dma.hbm_to_vmem [thread:$0]  %s3309_s0, 1024, %s21_s29, [#allocation4], %s2277_s7, %s2277_s7, %s2278_s8  }
  0x1b   :  { %s2279_s11 = smov [#allocation8]   ;;  %s2280_s13 = smov [#allocation9]  }
  0x1c   :  { %s44_s12 = sshll.u32 %s2279_s11, 4  ;;  %s58_s1 = sshll.u32 %s2280_s13, 4  ;;  %s45_s12 = int_to_ptr.vmem [resolvable:$true] %s44_s12  ;;  %s59_s1 = int_to_ptr.vmem [resolvable:$true] %s58_s1 }
  0x1d   :  { %s2213_s14 = scalar_lea.vmem %s45_s12, 8192  ;;  %p2218_p11 = scmp.lt.s32.totalorder %s45_s12, %s45_s12 }
  0x1e   :  { %p2214_p10 = scmp.ne.s32.totalorder %s45_s12, %s2213_s14  ;;  %p2219_p12 = scmp.lt.s32.totalorder %s2213_s14, %s2213_s14 }
  0x20   :  { %p2220_p13 = por %p2219_p12, %p2218_p11 }
  0x22   :  { %p2221_p0 = pnand %p2220_p13, %p2214_p10 }
  0x24   :  { %2224 = shalt.err (!%p2221_p0)
}
  0x25   :  { %50 = dma.hbm_to_vmem [thread:$0]  %s3311_s2, 8192, %s45_s12, [#allocation7], %s2274_s24, %s2274_s24, %s2275_s25  }
  0x26   :  { %s2233_s0 = scalar_lea.vmem %s59_s1, 2048  ;;  %p2238_p2 = scmp.lt.s32.totalorder %s59_s1, %s59_s1 }
  0x27   :  { %p2234_p1 = scmp.ne.s32.totalorder %s59_s1, %s2233_s0  ;;  %p2239_p3 = scmp.lt.s32.totalorder %s2233_s0, %s2233_s0 }
  0x29   :  { %p2240_p4 = por %p2239_p3, %p2238_p2 }
  0x2b   :  { %p2241_p5 = pnand %p2240_p4, %p2234_p1 }
  0x2d   :  { %2244 = shalt.err (!%p2241_p5)
}
  0x2e   :  { %64 = dma.hbm_to_vmem [thread:$0]  %s3313_s4, 2048, %s59_s1, [#allocation10], %s2277_s7, %s2277_s7, %s2278_s8  }
  0x2f   :  { %2265 = dma.done.wait [#allocation4], 1024  }
  0x30   :  { %2266 = vsyncadd [#allocation4], 4294966272 }
  0x31   :  { %2267 = dma.done.wait [#allocation7], 16384  }
  0x32   :  { %2268 = vsyncadd [#allocation7], 4294950912 }
  0x33   :  { %2269 = dma.done.wait [#allocation10], 2048  }
  0x34   :  { %2270 = vsyncadd [#allocation10], 4294965248  ;;  %v3316_v0 = vmov 0.0   ;;  %v148_v1 = vld [vmem:[#allocation6 + $0x1e8] sm:$0xff]  ;;  %v150_v2 = vld [vmem:[#allocation6 + $0x1f8] sm:$0xff]  ;;  %vm2282_vm0 = vmmov 0  }
  0x35   :  { %237 = vmatprep.mubr.f32.mxu0 %v3316_v0  ;;  %350 = vmatprep.mubr.f32.mxu1 %v3316_v0  ;;  %v147_v3 = vld [vmem:[#allocation6 + $0x1e0] sm:$0xff]  ;;  %v149_v4 = vld [vmem:[#allocation6 + $0x1f0] sm:$0xff]  ;;  %v144_v5 = vld [vmem:[#allocation6 + $0x1c8] sm:$0xff]  ;;  %s2283_s20 = smov [#allocation11]  }
  0x36   :  { %173 = vmatprep.subr.mxu0 %v148_v1  ;;  %286 = vmatprep.subr.mxu1 %v150_v2  ;;  %v146_v6 = vld [vmem:[#allocation6 + $0x1d8] sm:$0xff]  ;;  %v143_v7 = vld [vmem:[#allocation6 + $0x1c0] sm:$0xff]  ;;  %v145_v8 = vld [vmem:[#allocation6 + $0x1d0] sm:$0xff]  ;;  %s1946_s21 = sshll.u32 %s2283_s20, 4  ;;  %s1947_s21 = int_to_ptr.vmem [resolvable:$true] %s1946_s21 }
  0x37   :  { %174 = vmatpush1.msra.mxu0 %v147_v3  ;;  %287 = vmatpush1.msra.mxu1 %v149_v4  ;;  %v140_v9 = vld [vmem:[#allocation6 + $0x1a8] sm:$0xff]  ;;  %v142_v10 = vld [vmem:[#allocation6 + $0x1b8] sm:$0xff]  ;;  %v139_v11 = vld [vmem:[#allocation6 + $0x1a0] sm:$0xff]  ;;  %s2245_s22 = scalar_lea.vmem %s1947_s21, 128  ;;  %p2250_p7 = scmp.lt.s32.totalorder %s1947_s21, %s1947_s21 }
  0x38   :  { %175 = vmatprep.subr.mxu0 %v144_v5  ;;  %288 = vmatprep.subr.mxu1 %v146_v6  ;;  %v141_v12 = vld [vmem:[#allocation6 + $0x1b0] sm:$0xff]  ;;  %v136_v13 = vld [vmem:[#allocation6 + $0x188] sm:$0xff]  ;;  %v138_v14 = vld [vmem:[#allocation6 + $0x198] sm:$0xff]  ;;  %p2246_p6 = scmp.ne.s32.totalorder %s1947_s21, %s2245_s22  ;;  %p2251_p8 = scmp.lt.s32.totalorder %s2245_s22, %s2245_s22 }
  0x39   :  { %176 = vmatpush1.msra.mxu0 %v143_v7  ;;  %289 = vmatpush1.msra.mxu1 %v145_v8  ;;  %v135_v15 = vld [vmem:[#allocation6 + $0x180] sm:$0xff]  ;;  %v137_v16 = vld [vmem:[#allocation6 + $0x190] sm:$0xff]  ;;  %v132_v17 = vld [vmem:[#allocation6 + $0x168] sm:$0xff] }
  0x3a   :  { %177 = vmatprep.subr.mxu0 %v140_v9  ;;  %290 = vmatprep.subr.mxu1 %v142_v10  ;;  %v134_v18 = vld [vmem:[#allocation6 + $0x178] sm:$0xff]  ;;  %v131_v19 = vld [vmem:[#allocation6 + $0x160] sm:$0xff]  ;;  %v133_v20 = vld [vmem:[#allocation6 + $0x170] sm:$0xff]  ;;  %p2252_p9 = por %p2251_p8, %p2250_p7 }
  0x3b   :  { %178 = vmatpush1.msra.mxu0 %v139_v11  ;;  %291 = vmatpush1.msra.mxu1 %v141_v12  ;;  %v128_v21 = vld [vmem:[#allocation6 + $0x148] sm:$0xff]  ;;  %v130_v22 = vld [vmem:[#allocation6 + $0x158] sm:$0xff]  ;;  %v127_v23 = vld [vmem:[#allocation6 + $0x140] sm:$0xff] }
  0x3c   :  { %179 = vmatprep.subr.mxu0 %v136_v13  ;;  %292 = vmatprep.subr.mxu1 %v138_v14  ;;  %v129_v24 = vld [vmem:[#allocation6 + $0x150] sm:$0xff]  ;;  %v124_v25 = vld [vmem:[#allocation6 + $0x128] sm:$0xff]  ;;  %v126_v26 = vld [vmem:[#allocation6 + $0x138] sm:$0xff]  ;;  %p2253_p10 = pnand %p2252_p9, %p2246_p6 }
  0x3d   :  { %180 = vmatpush1.msra.mxu0 %v135_v15  ;;  %293 = vmatpush1.msra.mxu1 %v137_v16  ;;  %v123_v27 = vld [vmem:[#allocation6 + $0x120] sm:$0xff]  ;;  %v125_v28 = vld [vmem:[#allocation6 + $0x130] sm:$0xff]  ;;  %v120_v29 = vld [vmem:[#allocation6 + $0x108] sm:$0xff] }
  0x3e   :  { %181 = vmatprep.subr.mxu0 %v132_v17  ;;  %294 = vmatprep.subr.mxu1 %v134_v18  ;;  %v122_v30 = vld [vmem:[#allocation6 + $0x118] sm:$0xff]  ;;  %v119_v31 = vld [vmem:[#allocation6 + $0x100] sm:$0xff]  ;;  %v121_v32 = vld [vmem:[#allocation6 + $0x110] sm:$0xff] }
  0x3f   :  { %182 = vmatpush1.msra.mxu0 %v131_v19  ;;  %295 = vmatpush1.msra.mxu1 %v133_v20  ;;  %v116_v33 = vld [vmem:[#allocation6 + $0xe8] sm:$0xff]  ;;  %v118_v34 = vld [vmem:[#allocation6 + $0xf8] sm:$0xff]  ;;  %v115_v35 = vld [vmem:[#allocation6 + $0xe0] sm:$0xff] }
  0x40   :  { %183 = vmatprep.subr.mxu0 %v128_v21  ;;  %296 = vmatprep.subr.mxu1 %v130_v22  ;;  %v117_v36 = vld [vmem:[#allocation6 + $0xf0] sm:$0xff]  ;;  %v112_v37 = vld [vmem:[#allocation6 + $0xc8] sm:$0xff]  ;;  %v114_v38 = vld [vmem:[#allocation6 + $0xd8] sm:$0xff] }
  0x41   :  { %184 = vmatpush1.msra.mxu0 %v127_v23  ;;  %297 = vmatpush1.msra.mxu1 %v129_v24  ;;  %v111_v39 = vld [vmem:[#allocation6 + $0xc0] sm:$0xff]  ;;  %v113_v40 = vld [vmem:[#allocation6 + $0xd0] sm:$0xff]  ;;  %v108_v41 = vld [vmem:[#allocation6 + $0xa8] sm:$0xff] }
  0x42   :  { %185 = vmatprep.subr.mxu0 %v124_v25  ;;  %298 = vmatprep.subr.mxu1 %v126_v26  ;;  %v110_v42 = vld [vmem:[#allocation6 + $0xb8] sm:$0xff]  ;;  %v107_v43 = vld [vmem:[#allocation6 + $0xa0] sm:$0xff]  ;;  %v109_v44 = vld [vmem:[#allocation6 + $0xb0] sm:$0xff] }
  0x43   :  { %186 = vmatpush1.msra.mxu0 %v123_v27  ;;  %299 = vmatpush1.msra.mxu1 %v125_v28  ;;  %v104_v45 = vld [vmem:[#allocation6 + $0x88] sm:$0xff]  ;;  %v106_v46 = vld [vmem:[#allocation6 + $0x98] sm:$0xff]  ;;  %v103_v47 = vld [vmem:[#allocation6 + $0x80] sm:$0xff] }
  0x44   :  { %187 = vmatprep.subr.mxu0 %v120_v29  ;;  %300 = vmatprep.subr.mxu1 %v122_v30  ;;  %v105_v48 = vld [vmem:[#allocation6 + $0x90] sm:$0xff]  ;;  %v100_v49 = vld [vmem:[#allocation6 + $0x68] sm:$0xff]  ;;  %v102_v50 = vld [vmem:[#allocation6 + $0x78] sm:$0xff] }
  0x45   :  { %188 = vmatpush1.msra.mxu0 %v119_v31  ;;  %301 = vmatpush1.msra.mxu1 %v121_v32  ;;  %v99_v51 = vld [vmem:[#allocation6 + $0x60] sm:$0xff]  ;;  %v101_v52 = vld [vmem:[#allocation6 + $0x70] sm:$0xff]  ;;  %v96_v53 = vld [vmem:[#allocation6 + $0x48] sm:$0xff] }
  0x46   :  { %189 = vmatprep.subr.mxu0 %v116_v33  ;;  %302 = vmatprep.subr.mxu1 %v118_v34  ;;  %v98_v54 = vld [vmem:[#allocation6 + $0x58] sm:$0xff]  ;;  %v95_v55 = vld [vmem:[#allocation6 + $0x40] sm:$0xff]  ;;  %v97_v56 = vld [vmem:[#allocation6 + $0x50] sm:$0xff] }
  0x47   :  { %190 = vmatpush1.msra.mxu0 %v115_v35  ;;  %303 = vmatpush1.msra.mxu1 %v117_v36  ;;  %v92_v57 = vld [vmem:[#allocation6 + $0x28] sm:$0xff]  ;;  %v94_v58 = vld [vmem:[#allocation6 + $0x38] sm:$0xff]  ;;  %v91_v59 = vld [vmem:[#allocation6 + $0x20] sm:$0xff] }
  0x48   :  { %191 = vmatprep.subr.mxu0 %v112_v37  ;;  %304 = vmatprep.subr.mxu1 %v114_v38  ;;  %v93_v60 = vld [vmem:[#allocation6 + $0x30] sm:$0xff]  ;;  %v88_v61 = vld [vmem:[#allocation6 + $0x8] sm:$0xff]  ;;  %v90_v62 = vld [vmem:[#allocation6 + $0x18] sm:$0xff] }
  0x49   :  { %192 = vmatpush1.msra.mxu0 %v111_v39  ;;  %305 = vmatpush1.msra.mxu1 %v113_v40  ;;  %v87_v63 = vld [vmem:[#allocation6] sm:$0xff]  ;;  %v89_v1 = vld [vmem:[#allocation6 + $0x10] sm:$0xff]  ;;  %v2339_v3 = vld [vmem:[#allocation8 + $0x1e8] sm:$0xff] }
  0x4a   :  { %193 = vmatprep.subr.mxu0 %v108_v41  ;;  %306 = vmatprep.subr.mxu1 %v110_v42  ;;  %v79_v2 = vld [vmem:[#allocation3] sm:$0xff]  ;;  %3406 = vst [vmem:[#allocation16_spill] sm:$0xff] %v2339_v3  ;;  %v2341_v4 = vld [vmem:[#allocation8 + $0x1f8] sm:$0xff]  ;;  %v2345_v6 = vld [vmem:[#allocation8 + $0x1f0] sm:$0xff] }
  0x4b   :  { %194 = vmatpush1.msra.mxu0 %v107_v43  ;;  %307 = vmatpush1.msra.mxu1 %v109_v44  ;;  %3407 = vst [vmem:[#allocation17_spill] sm:$0xff] %v2341_v4  ;;  %v2343_v5 = vld [vmem:[#allocation8 + $0x1e0] sm:$0xff]  ;;  %v2347_v7 = vld [vmem:[#allocation8 + $0x1c8] sm:$0xff]  ;;  %v2349_v8 = vld [vmem:[#allocation8 + $0x1d8] sm:$0xff] }
  0x4c   :  { %195 = vmatprep.subr.mxu0 %v104_v45  ;;  %308 = vmatprep.subr.mxu1 %v106_v46  ;;  %v2355_v9 = vld [vmem:[#allocation8 + $0x1c0] sm:$0xff]  ;;  %v2357_v10 = vld [vmem:[#allocation8 + $0x1d0] sm:$0xff]  ;;  %v80_v11 = vld [vmem:[#allocation3 + $0x8] sm:$0xff] }
  0x4d   :  { %196 = vmatpush1.msra.mxu0 %v103_v47  ;;  %309 = vmatpush1.msra.mxu1 %v105_v48  ;;  %v2363_v12 = vld [vmem:[#allocation8 + $0x1a8] sm:$0xff]  ;;  %v2365_v13 = vld [vmem:[#allocation8 + $0x1b8] sm:$0xff]  ;;  %v2369_v14 = vld [vmem:[#allocation8 + $0x1a0] sm:$0xff] }
  0x4e   :  { %197 = vmatprep.subr.mxu0 %v100_v49  ;;  %310 = vmatprep.subr.mxu1 %v102_v50  ;;  %v2371_v15 = vld [vmem:[#allocation8 + $0x1b0] sm:$0xff]  ;;  %v2373_v16 = vld [vmem:[#allocation8 + $0x188] sm:$0xff]  ;;  %v2375_v17 = vld [vmem:[#allocation8 + $0x198] sm:$0xff] }
  0x4f   :  { %198 = vmatpush1.msra.mxu0 %v99_v51  ;;  %311 = vmatpush1.msra.mxu1 %v101_v52  ;;  %v2381_v18 = vld [vmem:[#allocation8 + $0x180] sm:$0xff]  ;;  %v2383_v19 = vld [vmem:[#allocation8 + $0x190] sm:$0xff]  ;;  %v2389_v21 = vld [vmem:[#allocation8 + $0x168] sm:$0xff] }
  0x50   :  { %199 = vmatprep.subr.mxu0 %v96_v53  ;;  %312 = vmatprep.subr.mxu1 %v98_v54  ;;  %v81_v20 = vld [vmem:[#allocation3 + $0x10] sm:$0xff]  ;;  %v2391_v22 = vld [vmem:[#allocation8 + $0x178] sm:$0xff]  ;;  %v2395_v23 = vld [vmem:[#allocation8 + $0x160] sm:$0xff] }
  0x51   :  { %200 = vmatpush1.msra.mxu0 %v95_v55  ;;  %313 = vmatpush1.msra.mxu1 %v97_v56  ;;  %v2397_v24 = vld [vmem:[#allocation8 + $0x170] sm:$0xff]  ;;  %v2399_v25 = vld [vmem:[#allocation8 + $0x148] sm:$0xff]  ;;  %v2401_v26 = vld [vmem:[#allocation8 + $0x158] sm:$0xff] }
  0x52   :  { %201 = vmatprep.subr.mxu0 %v92_v57  ;;  %314 = vmatprep.subr.mxu1 %v94_v58  ;;  %v2407_v27 = vld [vmem:[#allocation8 + $0x140] sm:$0xff]  ;;  %v2409_v28 = vld [vmem:[#allocation8 + $0x150] sm:$0xff]  ;;  %v82_v29 = vld [vmem:[#allocation3 + $0x18] sm:$0xff] }
  0x53   :  { %202 = vmatpush1.msra.mxu0 %v91_v59  ;;  %315 = vmatpush1.msra.mxu1 %v93_v60  ;;  %v2415_v30 = vld [vmem:[#allocation8 + $0x128] sm:$0xff]  ;;  %v2417_v31 = vld [vmem:[#allocation8 + $0x138] sm:$0xff]  ;;  %v2421_v32 = vld [vmem:[#allocation8 + $0x120] sm:$0xff] }
  0x54   :  { %203 = vmatprep.subr.mxu0 %v88_v61  ;;  %316 = vmatprep.subr.mxu1 %v90_v62  ;;  %v2423_v33 = vld [vmem:[#allocation8 + $0x130] sm:$0xff]  ;;  %v2425_v34 = vld [vmem:[#allocation8 + $0x108] sm:$0xff]  ;;  %v2427_v35 = vld [vmem:[#allocation8 + $0x118] sm:$0xff] }
  0x55   :  { %204 = vmatpush1.msra.mxu0 %v87_v63  ;;  %317 = vmatpush1.msra.mxu1 %v89_v1  ;;  %v2433_v36 = vld [vmem:[#allocation8 + $0x100] sm:$0xff]  ;;  %v2435_v37 = vld [vmem:[#allocation8 + $0x110] sm:$0xff]  ;;  %v2441_v39 = vld [vmem:[#allocation8 + $0xe8] sm:$0xff] }
  0x56   :  { %238 = vmatmul.mubr.f32.vlgmr.msra.gmra.mxu0 %v79_v2  ;;  %351 = vmatmul.mubr.f32.vlgmr.msra.gmra.mxu1 %v79_v2  ;;  %v83_v38 = vld [vmem:[#allocation3 + $0x20] sm:$0xff]  ;;  %v2443_v40 = vld [vmem:[#allocation8 + $0xf8] sm:$0xff]  ;;  %v2449_v42 = vld [vmem:[#allocation8 + $0xf0] sm:$0xff] }
  0x57   :  { %499 = vmatprep.subr.mxu0 %v2339_v3  ;;  %570 = vmatprep.subr.mxu1 %v2341_v4  ;;  %v2447_v41 = vld [vmem:[#allocation8 + $0xe0] sm:$0xff]  ;;  %v2451_v43 = vld [vmem:[#allocation8 + $0xc8] sm:$0xff]  ;;  %v2453_v44 = vld [vmem:[#allocation8 + $0xd8] sm:$0xff] }
  0x58   :  { %500 = vmatpush1.msra.mxu0 %v2343_v5  ;;  %571 = vmatpush1.msra.mxu1 %v2345_v6  ;;  %v2459_v45 = vld [vmem:[#allocation8 + $0xc0] sm:$0xff]  ;;  %v2461_v46 = vld [vmem:[#allocation8 + $0xd0] sm:$0xff]  ;;  %v84_v47 = vld [vmem:[#allocation3 + $0x28] sm:$0xff] }
  0x59   :  { %501 = vmatprep.subr.mxu0 %v2347_v7  ;;  %572 = vmatprep.subr.mxu1 %v2349_v8  ;;  %v2467_v48 = vld [vmem:[#allocation8 + $0xa8] sm:$0xff]  ;;  %v2469_v49 = vld [vmem:[#allocation8 + $0xb8] sm:$0xff]  ;;  %v2473_v50 = vld [vmem:[#allocation8 + $0xa0] sm:$0xff] }
  0x5a   :  { %243 = vmatprep.mubr.f32.mxu0 %v3316_v0  ;;  %356 = vmatprep.mubr.f32.mxu1 %v3316_v0  ;;  %v2475_v51 = vld [vmem:[#allocation8 + $0xb0] sm:$0xff]  ;;  %v2477_v52 = vld [vmem:[#allocation8 + $0x88] sm:$0xff]  ;;  %v2479_v53 = vld [vmem:[#allocation8 + $0x98] sm:$0xff] }
  0x5b   :  { %502 = vmatpush1.msra.mxu0 %v2355_v9  ;;  %573 = vmatpush1.msra.mxu1 %v2357_v10  ;;  %3408 = vst [vmem:[#allocation18_spill] sm:$0xff] %v2477_v52  ;;  %3409 = vst [vmem:[#allocation19_spill] sm:$0xff] %v2479_v53  ;;  %v2485_v54 = vld [vmem:[#allocation8 + $0x80] sm:$0xff]  ;;  %v2487_v55 = vld [vmem:[#allocation8 + $0x90] sm:$0xff] }
  0x5c   :  { %244 = vmatmul.mubr.f32.gmra.mxu0 %v80_v11  ;;  %357 = vmatmul.mubr.f32.gmra.mxu1 %v80_v11  ;;  %3410 = vst [vmem:[#allocation20_spill] sm:$0xff] %v2485_v54  ;;  %3411 = vst [vmem:[#allocation21_spill] sm:$0xff] %v2487_v55  ;;  %v85_v56 = vld [vmem:[#allocation3 + $0x30] sm:$0xff]  ;;  %v2493_v57 = vld [vmem:[#allocation8 + $0x68] sm:$0xff] }
  0x5d   :  { %503 = vmatprep.subr.mxu0 %v2363_v12  ;;  %574 = vmatprep.subr.mxu1 %v2365_v13  ;;  %3412 = vst [vmem:[#allocation22_spill] sm:$0xff] %v2493_v57  ;;  %v2495_v58 = vld [vmem:[#allocation8 + $0x78] sm:$0xff]  ;;  %v2499_v59 = vld [vmem:[#allocation8 + $0x60] sm:$0xff]  ;;  %v2501_v60 = vld [vmem:[#allocation8 + $0x70] sm:$0xff] }
  0x5e   :  { %504 = vmatpush1.msra.mxu0 %v2369_v14  ;;  %575 = vmatpush1.msra.mxu1 %v2371_v15  ;;  %3413 = vst [vmem:[#allocation23_spill] sm:$0xff] %v2495_v58  ;;  %3414 = vst [vmem:[#allocation24_spill] sm:$0xff] %v2499_v59  ;;  %v2503_v61 = vld [vmem:[#allocation8 + $0x48] sm:$0xff]  ;;  %v2505_v62 = vld [vmem:[#allocation8 + $0x58] sm:$0xff] }
  0x5f   :  { %505 = vmatprep.subr.mxu0 %v2373_v16  ;;  %576 = vmatprep.subr.mxu1 %v2375_v17  ;;  %3415 = vst [vmem:[#allocation25_spill] sm:$0xff] %v2501_v60  ;;  %3416 = vst [vmem:[#allocation26_spill] sm:$0xff] %v2503_v61  ;;  %v2511_v63 = vld [vmem:[#allocation8 + $0x40] sm:$0xff]  ;;  %v2513_v1 = vld [vmem:[#allocation8 + $0x50] sm:$0xff] }
  0x60   :  { %249 = vmatprep.mubr.f32.mxu0 %v3316_v0  ;;  %362 = vmatprep.mubr.f32.mxu1 %v3316_v0  ;;  %3417 = vst [vmem:[#allocation27_spill] sm:$0xff] %v2505_v62  ;;  %3418 = vst [vmem:[#allocation28_spill] sm:$0xff] %v2511_v63  ;;  %v86_v2 = vld [vmem:[#allocation3 + $0x38] sm:$0xff]  ;;  %v2519_v11 = vld [vmem:[#allocation8 + $0x28] sm:$0xff] }
  0x61   :  { %506 = vmatpush1.msra.mxu0 %v2381_v18  ;;  %577 = vmatpush1.msra.mxu1 %v2383_v19  ;;  %3419 = vst [vmem:[#allocation29_spill] sm:$0xff] %v2513_v1  ;;  %3420 = vst [vmem:[#allocation30_spill] sm:$0xff] %v2519_v11 }
  0x62   :  { %250 = vmatmul.mubr.f32.gmra.mxu0 %v81_v20  ;;  %363 = vmatmul.mubr.f32.gmra.mxu1 %v81_v20  ;;  %v2521_v20 = vld [vmem:[#allocation8 + $0x38] sm:$0xff] }
  0x63   :  { %507 = vmatprep.subr.mxu0 %v2389_v21  ;;  %578 = vmatprep.subr.mxu1 %v2391_v22  ;;  %3421 = vst [vmem:[#allocation31_spill] sm:$0xff] %v2521_v20 }
  0x64   :  { %508 = vmatpush1.msra.mxu0 %v2395_v23  ;;  %579 = vmatpush1.msra.mxu1 %v2397_v24 }
  0x65   :  { %509 = vmatprep.subr.mxu0 %v2399_v25  ;;  %580 = vmatprep.subr.mxu1 %v2401_v26 }
  0x66   :  { %255 = vmatprep.mubr.f32.mxu0 %v3316_v0  ;;  %368 = vmatprep.mubr.f32.mxu1 %v3316_v0 }
  0x67   :  { %510 = vmatpush1.msra.mxu0 %v2407_v27  ;;  %581 = vmatpush1.msra.mxu1 %v2409_v28 }
  0x68   :  { %256 = vmatmul.mubr.f32.gmra.mxu0 %v82_v29  ;;  %369 = vmatmul.mubr.f32.gmra.mxu1 %v82_v29  ;;  %v2525_v29 = vld [vmem:[#allocation8 + $0x20] sm:$0xff] }
  0x69   :  { %511 = vmatprep.subr.mxu0 %v2415_v30  ;;  %582 = vmatprep.subr.mxu1 %v2417_v31  ;;  %3422 = vst [vmem:[#allocation32_spill] sm:$0xff] %v2525_v29 }
  0x6a   :  { %512 = vmatpush1.msra.mxu0 %v2421_v32  ;;  %583 = vmatpush1.msra.mxu1 %v2423_v33 }
  0x6b   :  { %513 = vmatprep.subr.mxu0 %v2425_v34  ;;  %584 = vmatprep.subr.mxu1 %v2427_v35 }
  0x6c   :  { %261 = vmatprep.mubr.f32.mxu0 %v3316_v0  ;;  %374 = vmatprep.mubr.f32.mxu1 %v3316_v0 }
  0x6d   :  { %514 = vmatpush1.msra.mxu0 %v2433_v36  ;;  %585 = vmatpush1.msra.mxu1 %v2435_v37 }
  0x6e   :  { %262 = vmatmul.mubr.f32.gmra.mxu0 %v83_v38  ;;  %375 = vmatmul.mubr.f32.gmra.mxu1 %v83_v38  ;;  %v2527_v38 = vld [vmem:[#allocation8 + $0x30] sm:$0xff] }
  0x6f   :  { %515 = vmatprep.subr.mxu0 %v2441_v39  ;;  %586 = vmatprep.subr.mxu1 %v2443_v40  ;;  %3423 = vst [vmem:[#allocation33_spill] sm:$0xff] %v2527_v38 }
  0x70   :  { %516 = vmatpush1.msra.mxu0 %v2447_v41  ;;  %587 = vmatpush1.msra.mxu1 %v2449_v42 }
  0x71   :  { %517 = vmatprep.subr.mxu0 %v2451_v43  ;;  %588 = vmatprep.subr.mxu1 %v2453_v44 }
  0x72   :  { %267 = vmatprep.mubr.f32.mxu0 %v3316_v0  ;;  %380 = vmatprep.mubr.f32.mxu1 %v3316_v0 }
  0x73   :  { %518 = vmatpush1.msra.mxu0 %v2459_v45  ;;  %589 = vmatpush1.msra.mxu1 %v2461_v46 }
  0x74   :  { %268 = vmatmul.mubr.f32.gmra.mxu0 %v84_v47  ;;  %381 = vmatmul.mubr.f32.gmra.mxu1 %v84_v47  ;;  %v2529_v47 = vld [vmem:[#allocation8 + $0x8] sm:$0xff] }
  0x75   :  { %519 = vmatprep.subr.mxu0 %v2467_v48  ;;  %590 = vmatprep.subr.mxu1 %v2469_v49  ;;  %3424 = vst [vmem:[#allocation34_spill] sm:$0xff] %v2529_v47 }
  0x76   :  { %520 = vmatpush1.msra.mxu0 %v2473_v50  ;;  %591 = vmatpush1.msra.mxu1 %v2475_v51 }
  0x77   :  { %521 = vmatprep.subr.mxu0 %v2477_v52  ;;  %592 = vmatprep.subr.mxu1 %v2479_v53 }
  0x78   :  { %273 = vmatprep.mubr.f32.mxu0 %v3316_v0  ;;  %386 = vmatprep.mubr.f32.mxu1 %v3316_v0 }
  0x79   :  { %522 = vmatpush1.msra.mxu0 %v2485_v54  ;;  %593 = vmatpush1.msra.mxu1 %v2487_v55 }
  0x7a   :  { %274 = vmatmul.mubr.f32.gmra.mxu0 %v85_v56  ;;  %387 = vmatmul.mubr.f32.gmra.mxu1 %v85_v56  ;;  %v2531_v56 = vld [vmem:[#allocation8 + $0x18] sm:$0xff] }
  0x7b   :  { %523 = vmatprep.subr.mxu0 %v2493_v57  ;;  %594 = vmatprep.subr.mxu1 %v2495_v58  ;;  %3425 = vst [vmem:[#allocation35_spill] sm:$0xff] %v2531_v56 }
  0x7c   :  { %524 = vmatpush1.msra.mxu0 %v2499_v59  ;;  %595 = vmatpush1.msra.mxu1 %v2501_v60 }
  0x7d   :  { %525 = vmatprep.subr.mxu0 %v2503_v61  ;;  %596 = vmatprep.subr.mxu1 %v2505_v62 }
  0x7e   :  { %279 = vmatprep.mubr.f32.mxu0 %v3316_v0  ;;  %392 = vmatprep.mubr.f32.mxu1 %v3316_v0  ;;  %v2535_v0 = vld [vmem:[#allocation8] sm:$0xff] }
  0x7f   :  { %526 = vmatpush1.msra.mxu0 %v2511_v63  ;;  %597 = vmatpush1.msra.mxu1 %v2513_v1  ;;  %3426 = vst [vmem:[#allocation36_spill] sm:$0xff] %v2535_v0  ;;  %v2539_v1 = vld [vmem:[#allocation8 + $0x10] sm:$0xff] }
  0x80   :  { %280 = vmatmul.mubr.f32.gmra.mxu0 %v86_v2  ;;  %393 = vmatmul.mubr.f32.gmra.mxu1 %v86_v2  ;;  %3427 = vst [vmem:[#allocation37_spill] sm:$0xff] %v2539_v1  ;;  %v3428_v2 = vmov 0.0  }
  0x81   :  { %527 = vmatprep.subr.mxu0 %v2519_v11  ;;  %598 = vmatprep.subr.mxu1 %v2521_v20 }
  0x82   :  { %528 = vmatpush1.msra.mxu0 %v2525_v29  ;;  %599 = vmatpush1.msra.mxu1 %v2527_v38 }
  0x83   :  { %529 = vmatprep.subr.mxu0 %v2529_v47  ;;  %600 = vmatprep.subr.mxu1 %v2531_v56 }
  0x84   :  { %530 = vmatpush1.msra.mxu0 %v2535_v0  ;;  %563 = vmatprep.mubr.f32.mxu0 %v3428_v2 }
  0x85   :  { %601 = vmatpush1.msra.mxu1 %v2539_v1  ;;  %634 = vmatprep.mubr.f32.mxu1 %v3428_v2 }
  0x86   :  { %564 = vmatmul.mubr.f32.vlgmr.msra.gmra.mxu0 %v3428_v2  ;;  %635 = vmatmul.mubr.f32.vlgmr.msra.gmra.mxu1 %v3428_v2 }
  0x87   :  { %668 = vmatprep.subr.mxu0 %v2339_v3  ;;  %739 = vmatprep.subr.mxu1 %v2341_v4 }
  0x88   :  { %669 = vmatpush1.msra.mxu0 %v2343_v5  ;;  %740 = vmatpush1.msra.mxu1 %v2345_v6 }
  0x89   :  { %670 = vmatprep.subr.mxu0 %v2347_v7  ;;  %741 = vmatprep.subr.mxu1 %v2349_v8 }
  0x8a   :  { %671 = vmatpush1.msra.mxu0 %v2355_v9  ;;  %742 = vmatpush1.msra.mxu1 %v2357_v10 }
  0x8b   :  { %672 = vmatprep.subr.mxu0 %v2363_v12  ;;  %743 = vmatprep.subr.mxu1 %v2365_v13 }
  0x8c   :  { %673 = vmatpush1.msra.mxu0 %v2369_v14  ;;  %744 = vmatpush1.msra.mxu1 %v2371_v15 }
  0x8d   :  { %674 = vmatprep.subr.mxu0 %v2373_v16  ;;  %745 = vmatprep.subr.mxu1 %v2375_v17 }
  0x8e   :  { %675 = vmatpush1.msra.mxu0 %v2381_v18  ;;  %746 = vmatpush1.msra.mxu1 %v2383_v19 }
  0x8f   :  { %676 = vmatprep.subr.mxu0 %v2389_v21  ;;  %747 = vmatprep.subr.mxu1 %v2391_v22 }
  0x90   :  { %677 = vmatpush1.msra.mxu0 %v2395_v23  ;;  %748 = vmatpush1.msra.mxu1 %v2397_v24 }
  0x91   :  { %678 = vmatprep.subr.mxu0 %v2399_v25  ;;  %749 = vmatprep.subr.mxu1 %v2401_v26 }
  0x92   :  { %679 = vmatpush1.msra.mxu0 %v2407_v27  ;;  %750 = vmatpush1.msra.mxu1 %v2409_v28 }
  0x93   :  { %680 = vmatprep.subr.mxu0 %v2415_v30  ;;  %751 = vmatprep.subr.mxu1 %v2417_v31 }
  0x94   :  { %681 = vmatpush1.msra.mxu0 %v2421_v32  ;;  %752 = vmatpush1.msra.mxu1 %v2423_v33 }
  0x95   :  { %682 = vmatprep.subr.mxu0 %v2425_v34  ;;  %753 = vmatprep.subr.mxu1 %v2427_v35 }
  0x96   :  { %683 = vmatpush1.msra.mxu0 %v2433_v36  ;;  %754 = vmatpush1.msra.mxu1 %v2435_v37 }
  0x97   :  { %684 = vmatprep.subr.mxu0 %v2441_v39  ;;  %755 = vmatprep.subr.mxu1 %v2443_v40 }
  0x98   :  { %685 = vmatpush1.msra.mxu0 %v2447_v41  ;;  %756 = vmatpush1.msra.mxu1 %v2449_v42 }
  0x99   :  { %686 = vmatprep.subr.mxu0 %v2451_v43  ;;  %757 = vmatprep.subr.mxu1 %v2453_v44 }
  0x9a   :  { %687 = vmatpush1.msra.mxu0 %v2459_v45  ;;  %758 = vmatpush1.msra.mxu1 %v2461_v46 }
  0x9b   :  { %688 = vmatprep.subr.mxu0 %v2467_v48  ;;  %759 = vmatprep.subr.mxu1 %v2469_v49 }
  0x9c   :  { %689 = vmatpush1.msra.mxu0 %v2473_v50  ;;  %760 = vmatpush1.msra.mxu1 %v2475_v51 }
  0x9d   :  { %690 = vmatprep.subr.mxu0 %v2477_v52  ;;  %761 = vmatprep.subr.mxu1 %v2479_v53  ;;  %v3429_v52 = vld [vmem:[#allocation29_spill] sm:$0xff] }
  0x9e   :  { %691 = vmatpush1.msra.mxu0 %v2485_v54  ;;  %762 = vmatpush1.msra.mxu1 %v2487_v55 }
  0x9f   :  { %692 = vmatprep.subr.mxu0 %v2493_v57  ;;  %763 = vmatprep.subr.mxu1 %v2495_v58 }
  0xa0   :  { %693 = vmatpush1.msra.mxu0 %v2499_v59  ;;  %764 = vmatpush1.msra.mxu1 %v2501_v60 }
  0xa1   :  { %694 = vmatprep.subr.mxu0 %v2503_v61  ;;  %765 = vmatprep.subr.mxu1 %v2505_v62 }
  0xa2   :  { %695 = vmatpush1.msra.mxu0 %v2511_v63  ;;  %766 = vmatpush1.msra.mxu1 %v3429_v52 }
  0xa3   :  { %696 = vmatprep.subr.mxu0 %v2519_v11  ;;  %767 = vmatprep.subr.mxu1 %v2521_v20  ;;  %v153_v20 = vlaneseq }
  0xa4   :  { %697 = vmatpush1.msra.mxu0 %v2525_v29  ;;  %768 = vmatpush1.msra.mxu1 %v2527_v38 }
  0xa5   :  { %698 = vmatprep.subr.mxu0 %v2529_v47  ;;  %769 = vmatprep.subr.mxu1 %v2531_v56  ;;  %v154_v29 = vshrl.u32 %v153_v20, 7 }
  0xa6   :  { %699 = vmatpush1.msra.mxu0 %v2535_v0  ;;  %732 = vmatprep.mubr.f32.mxu0 %v3428_v2  ;;  %v151_v0 = vld [vmem:[%s3312_s3] sm:$0xf] }
  0xa7   :  { %770 = vmatpush1.msra.mxu1 %v2539_v1  ;;  %803 = vmatprep.mubr.f32.mxu1 %v3428_v2  ;;  %v155_v47 = vsub.s32 0, %v154_v29  ;;  %v163_v56 = vsub.s32 2, %v154_v29  ;;  %v159_v2 = vsub.s32 1, %v154_v29 }
  0xa8   :  { %837 = vmatprep.subr.mxu0 %v2339_v3  ;;  %908 = vmatprep.subr.mxu1 %v2341_v4  ;;  %v167_v3 = vsub.s32 3, %v154_v29 }
  0xa9   :  { %v156_v63 = vrot.slane %v151_v0, %v155_v47  ;;  %v2628_v4 = vrot.slane %v151_v0, %v163_v56  ;;  %v160_v61 = vrot.slane %v151_v0, %v159_v2 }
  0xaa   :  { %v2630_v60 = vrot.slane %v151_v0, %v167_v3 }
 0x116   :  { %v2617_v11 = vpop.f32.mrf.mxu0  ;;  %v2619_v38 = vpop.f32.mrf.mxu1 }
 0x118   :  { %v2624_v52 = vpop.f32.mrf.mxu0  ;;  %v2626_v1 = vpop.f32.mrf.mxu1 }
 0x11c   :  { %v245_v20 = vpop.f32.mrf.mxu0  ;;  %v358_v62 = vpop.f32.mrf.mxu1 }
 0x11d   :  { %v2632_v59 = vadd.f32 %v245_v20, %v156_v63  ;;  %v2635_v58 = vadd.f32 %v358_v62, %v2628_v4 }
 0x11e   :  { %v247_v57 = vpop.f32.mrf.mxu0  ;;  %v360_v55 = vpop.f32.mrf.mxu1 }
 0x11f   :  { %3430 = vst [vmem:[#allocation38_spill] sm:$0xff] %v2632_v59  ;;  %3431 = vst [vmem:[#allocation39_spill] sm:$0xff] %v2635_v58  ;;  %v2637_v54 = vadd.f32 %v247_v57, %v160_v61  ;;  %v2640_v53 = vadd.f32 %v360_v55, %v2630_v60 }
 0x121   :  { %3432 = vst [vmem:[#allocation40_spill] sm:$0xff] %v2637_v54  ;;  %3433 = vst [vmem:[#allocation41_spill] sm:$0xff] %v2640_v53 }
 0x122   :  { %v251_v29 = vpop.f32.mrf.mxu0  ;;  %v364_v47 = vpop.f32.mrf.mxu1 }
 0x123   :  { %v2642_v56 = vadd.f32 %v251_v29, %v156_v63  ;;  %v2645_v2 = vadd.f32 %v364_v47, %v2628_v4 }
 0x124   :  { %v253_v0 = vpop.f32.mrf.mxu0  ;;  %v366_v3 = vpop.f32.mrf.mxu1 }
 0x125   :  { %3434 = vst [vmem:[#allocation42_spill] sm:$0xff] %v2642_v56  ;;  %3435 = vst [vmem:[#allocation43_spill] sm:$0xff] %v2645_v2  ;;  %v2647_v20 = vadd.f32 %v253_v0, %v160_v61  ;;  %v2650_v62 = vadd.f32 %v366_v3, %v2630_v60 }
 0x127   :  { %3436 = vst [vmem:[#allocation44_spill] sm:$0xff] %v2647_v20  ;;  %3437 = vst [vmem:[#allocation45_spill] sm:$0xff] %v2650_v62 }
 0x128   :  { %v257_v58 = vpop.f32.mrf.mxu0  ;;  %v370_v57 = vpop.f32.mrf.mxu1 }
 0x129   :  { %v2652_v54 = vadd.f32 %v257_v58, %v156_v63  ;;  %v2655_v55 = vadd.f32 %v370_v57, %v2628_v4 }
 0x12a   :  { %v259_v53 = vpop.f32.mrf.mxu0  ;;  %v372_v29 = vpop.f32.mrf.mxu1 }
 0x12b   :  { %3438 = vst [vmem:[#allocation46_spill] sm:$0xff] %v2652_v54  ;;  %3439 = vst [vmem:[#allocation47_spill] sm:$0xff] %v2655_v55  ;;  %v2657_v56 = vadd.f32 %v259_v53, %v160_v61  ;;  %v2660_v47 = vadd.f32 %v372_v29, %v2630_v60 }
 0x12d   :  { %3440 = vst [vmem:[#allocation48_spill] sm:$0xff] %v2657_v56  ;;  %3441 = vst [vmem:[#allocation49_spill] sm:$0xff] %v2660_v47 }
 0x12e   :  { %v263_v2 = vpop.f32.mrf.mxu0  ;;  %v376_v0 = vpop.f32.mrf.mxu1 }
 0x12f   :  { %v2662_v20 = vadd.f32 %v263_v2, %v156_v63  ;;  %v2665_v3 = vadd.f32 %v376_v0, %v2628_v4 }
 0x130   :  { %v265_v62 = vpop.f32.mrf.mxu0  ;;  %v378_v58 = vpop.f32.mrf.mxu1 }
 0x131   :  { %3442 = vst [vmem:[#allocation50_spill] sm:$0xff] %v2662_v20  ;;  %3443 = vst [vmem:[#allocation51_spill] sm:$0xff] %v2665_v3  ;;  %v2667_v54 = vadd.f32 %v265_v62, %v160_v61  ;;  %v2670_v57 = vadd.f32 %v378_v58, %v2630_v60 }
 0x133   :  { %3444 = vst [vmem:[#allocation52_spill] sm:$0xff] %v2667_v54  ;;  %3445 = vst [vmem:[#allocation53_spill] sm:$0xff] %v2670_v57 }
 0x134   :  { %v269_v55 = vpop.f32.mrf.mxu0  ;;  %v382_v53 = vpop.f32.mrf.mxu1 }
 0x135   :  { %v2672_v56 = vadd.f32 %v269_v55, %v156_v63  ;;  %v2675_v29 = vadd.f32 %v382_v53, %v2628_v4 }
 0x136   :  { %v271_v47 = vpop.f32.mrf.mxu0  ;;  %v384_v2 = vpop.f32.mrf.mxu1 }
 0x137   :  { %3446 = vst [vmem:[#allocation54_spill] sm:$0xff] %v2672_v56  ;;  %3447 = vst [vmem:[#allocation55_spill] sm:$0xff] %v2675_v29  ;;  %v2677_v20 = vadd.f32 %v271_v47, %v160_v61  ;;  %v2680_v0 = vadd.f32 %v384_v2, %v2630_v60 }
 0x139   :  { %3448 = vst [vmem:[#allocation56_spill] sm:$0xff] %v2677_v20  ;;  %3449 = vst [vmem:[#allocation57_spill] sm:$0xff] %v2680_v0 }
 0x13a   :  { %v275_v3 = vpop.f32.mrf.mxu0  ;;  %v388_v62 = vpop.f32.mrf.mxu1 }
 0x13b   :  { %v2682_v54 = vadd.f32 %v275_v3, %v156_v63  ;;  %v2685_v58 = vadd.f32 %v388_v62, %v2628_v4 }
 0x13c   :  { %v277_v57 = vpop.f32.mrf.mxu0  ;;  %v390_v55 = vpop.f32.mrf.mxu1 }
 0x13d   :  { %3450 = vst [vmem:[#allocation58_spill] sm:$0xff] %v2682_v54  ;;  %3451 = vst [vmem:[#allocation59_spill] sm:$0xff] %v2685_v58  ;;  %v2687_v56 = vadd.f32 %v277_v57, %v160_v61  ;;  %v2690_v53 = vadd.f32 %v390_v55, %v2630_v60  ;;  %v240_v57 = vadd.f32 %v2617_v11, %v156_v63 }
 0x13e   :  { %v242_v55 = vadd.f32 %v2624_v52, %v160_v61 }
 0x13f   :  { %3452 = vst [vmem:[#allocation60_spill] sm:$0xff] %v2687_v56  ;;  %3453 = vst [vmem:[#allocation61_spill] sm:$0xff] %v2690_v53 }
 0x140   :  { %v281_v29 = vpop.f32.mrf.mxu0  ;;  %v394_v47 = vpop.f32.mrf.mxu1 }
 0x141   :  { %v2692_v20 = vadd.f32 %v281_v29, %v156_v63  ;;  %v2695_v2 = vadd.f32 %v394_v47, %v2628_v4  ;;  %v353_v47 = vadd.f32 %v2619_v38, %v2628_v4 }
 0x142   :  { %v283_v0 = vpop.f32.mrf.mxu0  ;;  %v396_v3 = vpop.f32.mrf.mxu1 }
 0x143   :  { %3454 = vst [vmem:[#allocation62_spill] sm:$0xff] %v2692_v20  ;;  %3455 = vst [vmem:[#allocation63_spill] sm:$0xff] %v2695_v2  ;;  %v2697_v54 = vadd.f32 %v283_v0, %v160_v61  ;;  %v2700_v62 = vadd.f32 %v396_v3, %v2630_v60  ;;  %v355_v3 = vadd.f32 %v2626_v1, %v2630_v60 }
 0x145   :  { %3456 = vst [vmem:[#allocation64_spill] sm:$0xff] %v2697_v54  ;;  %3457 = vst [vmem:[#allocation65_spill] sm:$0xff] %v2700_v62  ;;  %v3478_v62 = vld [vmem:[#allocation37_spill] sm:$0xff] }
 0x146   :  { %v565_v58 = vpop.f32.mrf.mxu0  ;;  %v636_v20 = vpop.f32.mrf.mxu1 }
 0x147   :  { %v641_v53 = vadd.f32 %v565_v58, %v240_v57  ;;  %v643_v0 = vadd.f32 %v636_v20, %v353_v47  ;;  %v3459_v47 = vld [vmem:[#allocation19_spill] sm:$0xff] }
 0x148   :  { %v567_v56 = vpop.f32.mrf.mxu0  ;;  %v638_v54 = vpop.f32.mrf.mxu1 }
 0x149   :  { %v645_v59 = vmul.f32 0.5, %v641_v53  ;;  %v642_v29 = vadd.f32 %v567_v56, %v242_v55  ;;  %v644_v63 = vadd.f32 %v638_v54, %v355_v3  ;;  %v3461_v3 = vld [vmem:[#allocation21_spill] sm:$0xff] }
 0x14b   :  { %2021 = vtanh.f32 %v645_v59  ;;  %v649_v2 = vmul.f32 0.5, %v642_v29  ;;  %v654_v11 = vmul.f32 0.5, %v644_v63  ;;  %v3458_v29 = vld [vmem:[#allocation18_spill] sm:$0xff] }
 0x14c   :  { %v3462_v63 = vld [vmem:[#allocation22_spill] sm:$0xff] }
 0x14d   :  { %2023 = vtanh.f32 %v649_v2 }
 0x14e   :  { %2025 = vtanh.f32 %v643_v0  ;;  %v3460_v0 = vld [vmem:[#allocation20_spill] sm:$0xff] }
 0x14f   :  { %2027 = vtanh.f32 %v654_v11  ;;  %v3463_v11 = vld [vmem:[#allocation23_spill] sm:$0xff] }
 0x158   :  { %v2022_v52 = vpop.eup %2021 }
 0x159   :  { %v647_v61 = vmul.f32 0.5, %v2022_v52  ;;  %v3464_v52 = vld [vmem:[#allocation24_spill] sm:$0xff] }
 0x15a   :  { %v2024_v58 = vpop.eup %2023 }
 0x15b   :  { %v648_v53 = vadd.f32 0.5, %v647_v61  ;;  %v651_v56 = vmul.f32 0.5, %v2024_v58  ;;  %v2026_v55 = vpop.eup %2025  ;;  %v3465_v61 = vld [vmem:[#allocation25_spill] sm:$0xff]  ;;  %v3466_v58 = vld [vmem:[#allocation26_spill] sm:$0xff] }
 0x15c   :  { %v2028_v20 = vpop.eup %2027 }
 0x15d   :  { %v652_v57 = vadd.f32 0.5, %v651_v56  ;;  %v659_v59 = vmul.f32 %v2026_v55, %v648_v53  ;;  %v656_v2 = vmul.f32 0.5, %v2028_v20  ;;  %v3467_v53 = vld [vmem:[#allocation27_spill] sm:$0xff]  ;;  %v3468_v56 = vld [vmem:[#allocation28_spill] sm:$0xff]  ;;  %v3470_v55 = vld [vmem:[#allocation30_spill] sm:$0xff] }
 0x15e   :  { %v3473_v20 = vld [vmem:[#allocation33_spill] sm:$0xff] }
 0x15f   :  { %v658_v4 = vmul.f32 0.0, %v652_v57  ;;  %v657_v60 = vadd.f32 0.5, %v656_v2  ;;  %v3469_v57 = vld [vmem:[#allocation29_spill] sm:$0xff]  ;;  %v3474_v2 = vld [vmem:[#allocation34_spill] sm:$0xff] }
 0x161   :  { %v2708_v38 = vadd.f32 %v659_v59, %v658_v4  ;;  %v3471_v4 = vld [vmem:[#allocation31_spill] sm:$0xff]  ;;  %v3472_v59 = vld [vmem:[#allocation32_spill] sm:$0xff] }
 0x163   :  { %2029 = vtanh.f32 %v2708_v38 }
 0x170   :  { %v2030_v1 = vpop.eup %2029 }
 0x171   :  { %v662_v54 = vmul.f32 %v2030_v1, %v657_v60  ;;  %v3475_v60 = vld [vmem:[#allocation35_spill] sm:$0xff]  ;;  %v3476_v1 = vld [vmem:[#allocation36_spill] sm:$0xff] }
 0x173   :  { %733 = vmatmul.mubr.f32.vlgmr.msra.gmra.mxu0 %v662_v54  ;;  %804 = vmatmul.mubr.f32.vlgmr.msra.gmra.mxu1 %v662_v54  ;;  %v3477_v54 = vmov 0.0  }
 0x174   :  { %838 = vmatpush1.msra.mxu0 %v2343_v5  ;;  %909 = vmatpush1.msra.mxu1 %v2345_v6 }
 0x175   :  { %839 = vmatprep.subr.mxu0 %v2347_v7  ;;  %910 = vmatprep.subr.mxu1 %v2349_v8 }
 0x176   :  { %840 = vmatpush1.msra.mxu0 %v2355_v9  ;;  %911 = vmatpush1.msra.mxu1 %v2357_v10 }
 0x177   :  { %841 = vmatprep.subr.mxu0 %v2363_v12  ;;  %912 = vmatprep.subr.mxu1 %v2365_v13 }
 0x178   :  { %842 = vmatpush1.msra.mxu0 %v2369_v14  ;;  %913 = vmatpush1.msra.mxu1 %v2371_v15 }
 0x179   :  { %843 = vmatprep.subr.mxu0 %v2373_v16  ;;  %914 = vmatprep.subr.mxu1 %v2375_v17 }
 0x17a   :  { %844 = vmatpush1.msra.mxu0 %v2381_v18  ;;  %915 = vmatpush1.msra.mxu1 %v2383_v19 }
 0x17b   :  { %845 = vmatprep.subr.mxu0 %v2389_v21  ;;  %916 = vmatprep.subr.mxu1 %v2391_v22 }
 0x17c   :  { %846 = vmatpush1.msra.mxu0 %v2395_v23  ;;  %917 = vmatpush1.msra.mxu1 %v2397_v24 }
 0x17d   :  { %847 = vmatprep.subr.mxu0 %v2399_v25  ;;  %918 = vmatprep.subr.mxu1 %v2401_v26 }
 0x17e   :  { %848 = vmatpush1.msra.mxu0 %v2407_v27  ;;  %919 = vmatpush1.msra.mxu1 %v2409_v28 }
 0x17f   :  { %849 = vmatprep.subr.mxu0 %v2415_v30  ;;  %920 = vmatprep.subr.mxu1 %v2417_v31 }
 0x180   :  { %850 = vmatpush1.msra.mxu0 %v2421_v32  ;;  %921 = vmatpush1.msra.mxu1 %v2423_v33 }
 0x181   :  { %851 = vmatprep.subr.mxu0 %v2425_v34  ;;  %922 = vmatprep.subr.mxu1 %v2427_v35 }
 0x182   :  { %852 = vmatpush1.msra.mxu0 %v2433_v36  ;;  %923 = vmatpush1.msra.mxu1 %v2435_v37 }
 0x183   :  { %853 = vmatprep.subr.mxu0 %v2441_v39  ;;  %924 = vmatprep.subr.mxu1 %v2443_v40 }
 0x184   :  { %854 = vmatpush1.msra.mxu0 %v2447_v41  ;;  %925 = vmatpush1.msra.mxu1 %v2449_v42 }
 0x185   :  { %855 = vmatprep.subr.mxu0 %v2451_v43  ;;  %926 = vmatprep.subr.mxu1 %v2453_v44 }
 0x186   :  { %856 = vmatpush1.msra.mxu0 %v2459_v45  ;;  %927 = vmatpush1.msra.mxu1 %v2461_v46 }
 0x187   :  { %857 = vmatprep.subr.mxu0 %v2467_v48  ;;  %928 = vmatprep.subr.mxu1 %v2469_v49 }
 0x188   :  { %858 = vmatpush1.msra.mxu0 %v2473_v50  ;;  %929 = vmatpush1.msra.mxu1 %v2475_v51 }
 0x189   :  { %859 = vmatprep.subr.mxu0 %v3458_v29  ;;  %930 = vmatprep.subr.mxu1 %v3459_v47 }
 0x18a   :  { %860 = vmatpush1.msra.mxu0 %v3460_v0  ;;  %931 = vmatpush1.msra.mxu1 %v3461_v3 }
 0x18b   :  { %861 = vmatprep.subr.mxu0 %v3462_v63  ;;  %932 = vmatprep.subr.mxu1 %v3463_v11 }
 0x18c   :  { %862 = vmatpush1.msra.mxu0 %v3464_v52  ;;  %933 = vmatpush1.msra.mxu1 %v3465_v61 }
 0x18d   :  { %863 = vmatprep.subr.mxu0 %v3466_v58  ;;  %934 = vmatprep.subr.mxu1 %v3467_v53  ;;  %v3482_v58 = vld [vmem:[#allocation40_spill] sm:$0xff] }
 0x18e   :  { %864 = vmatpush1.msra.mxu0 %v3468_v56  ;;  %935 = vmatpush1.msra.mxu1 %v3469_v57  ;;  %v3479_v57 = vld [vmem:[#allocation16_spill] sm:$0xff] }
 0x18f   :  { %865 = vmatprep.subr.mxu0 %v3470_v55  ;;  %936 = vmatprep.subr.mxu1 %v3471_v4  ;;  %v3480_v55 = vld [vmem:[#allocation17_spill] sm:$0xff] }
 0x190   :  { %866 = vmatpush1.msra.mxu0 %v3472_v59  ;;  %937 = vmatpush1.msra.mxu1 %v3473_v20  ;;  %v3481_v59 = vld [vmem:[#allocation38_spill] sm:$0xff] }
 0x191   :  { %867 = vmatprep.subr.mxu0 %v3474_v2  ;;  %938 = vmatprep.subr.mxu1 %v3475_v60 }
 0x192   :  { %868 = vmatpush1.msra.mxu0 %v3476_v1  ;;  %901 = vmatprep.mubr.f32.mxu0 %v3477_v54  ;;  %v3483_v1 = vld [vmem:[#allocation39_spill] sm:$0xff] }
 0x193   :  { %939 = vmatpush1.msra.mxu1 %v3478_v62  ;;  %972 = vmatprep.mubr.f32.mxu1 %v3477_v54  ;;  %v3484_v54 = vld [vmem:[#allocation41_spill] sm:$0xff] }
 0x194   :  { %1006 = vmatprep.subr.mxu0 %v3479_v57  ;;  %1077 = vmatprep.subr.mxu1 %v3480_v55 }
 0x233   :  { %v734_v4 = vpop.f32.mrf.mxu0  ;;  %v805_v20 = vpop.f32.mrf.mxu1 }
 0x234   :  { %v810_v56 = vadd.f32 %v734_v4, %v3481_v59  ;;  %v812_v61 = vadd.f32 %v805_v20, %v3483_v1 }
 0x235   :  { %v736_v53 = vpop.f32.mrf.mxu0  ;;  %v807_v62 = vpop.f32.mrf.mxu1 }
 0x236   :  { %v814_v2 = vmul.f32 0.5, %v810_v56  ;;  %v811_v60 = vadd.f32 %v736_v53, %v3482_v58  ;;  %v813_v11 = vadd.f32 %v807_v62, %v3484_v54  ;;  %v3509_v54 = vld [vmem:[#allocation43_spill] sm:$0xff] }
 0x238   :  { %2031 = vtanh.f32 %v814_v2  ;;  %v818_v52 = vmul.f32 0.5, %v811_v60  ;;  %v823_v57 = vmul.f32 0.5, %v813_v11  ;;  %v3508_v60 = vld [vmem:[#allocation44_spill] sm:$0xff] }
 0x23a   :  { %2033 = vtanh.f32 %v818_v52 }
 0x23b   :  { %2035 = vtanh.f32 %v812_v61 }
 0x23c   :  { %2037 = vtanh.f32 %v823_v57 }
 0x245   :  { %v2032_v63 = vpop.eup %2031 }
 0x246   :  { %v816_v55 = vmul.f32 0.5, %v2032_v63 }
 0x247   :  { %v2034_v3 = vpop.eup %2033 }
 0x248   :  { %v817_v0 = vadd.f32 0.5, %v816_v55  ;;  %v820_v4 = vmul.f32 0.5, %v2034_v3  ;;  %v2036_v59 = vpop.eup %2035  ;;  %v3507_v3 = vld [vmem:[#allocation42_spill] sm:$0xff] }
 0x249   :  { %v2038_v52 = vpop.eup %2037 }
 0x24a   :  { %v821_v56 = vadd.f32 0.5, %v820_v4  ;;  %v828_v47 = vmul.f32 %v2036_v59, %v817_v0  ;;  %v825_v61 = vmul.f32 0.5, %v2038_v52 }
 0x24c   :  { %v827_v58 = vmul.f32 %v821_v56, %v2708_v38  ;;  %v826_v20 = vadd.f32 0.5, %v825_v61  ;;  %v3505_v38 = vld [vmem:[#allocation16_spill] sm:$0xff] }
 0x24e   :  { %v2782_v53 = vadd.f32 %v828_v47, %v827_v58  ;;  %v3506_v47 = vld [vmem:[#allocation17_spill] sm:$0xff] }
 0x24f   :  { %v3510_v58 = vld [vmem:[#allocation45_spill] sm:$0xff] }
 0x250   :  { %2039 = vtanh.f32 %v2782_v53 }
 0x25d   :  { %v2040_v62 = vpop.eup %2039 }
 0x25e   :  { %v831_v11 = vmul.f32 %v2040_v62, %v826_v20 }
 0x260   :  { %902 = vmatmul.mubr.f32.vlgmr.msra.gmra.mxu0 %v831_v11  ;;  %973 = vmatmul.mubr.f32.vlgmr.msra.gmra.mxu1 %v831_v11 }
 0x261   :  { %1007 = vmatpush1.msra.mxu0 %v2343_v5  ;;  %1078 = vmatpush1.msra.mxu1 %v2345_v6  ;;  %v3485_v5 = vld [vmem:[#allocation19_spill] sm:$0xff]  ;;  %v3486_v6 = vld [vmem:[#allocation20_spill] sm:$0xff] }
 0x262   :  { %1008 = vmatprep.subr.mxu0 %v2347_v7  ;;  %1079 = vmatprep.subr.mxu1 %v2349_v8  ;;  %v3487_v7 = vld [vmem:[#allocation21_spill] sm:$0xff]  ;;  %v3488_v8 = vld [vmem:[#allocation22_spill] sm:$0xff] }
 0x263   :  { %1009 = vmatpush1.msra.mxu0 %v2355_v9  ;;  %1080 = vmatpush1.msra.mxu1 %v2357_v10  ;;  %v3489_v9 = vld [vmem:[#allocation23_spill] sm:$0xff]  ;;  %v3490_v10 = vld [vmem:[#allocation24_spill] sm:$0xff] }
 0x264   :  { %1010 = vmatprep.subr.mxu0 %v2363_v12  ;;  %1081 = vmatprep.subr.mxu1 %v2365_v13  ;;  %v3491_v12 = vld [vmem:[#allocation25_spill] sm:$0xff]  ;;  %v3492_v13 = vld [vmem:[#allocation26_spill] sm:$0xff] }
 0x265   :  { %1011 = vmatpush1.msra.mxu0 %v2369_v14  ;;  %1082 = vmatpush1.msra.mxu1 %v2371_v15  ;;  %v3493_v14 = vld [vmem:[#allocation27_spill] sm:$0xff]  ;;  %v3494_v15 = vld [vmem:[#allocation28_spill] sm:$0xff] }
 0x266   :  { %1012 = vmatprep.subr.mxu0 %v2373_v16  ;;  %1083 = vmatprep.subr.mxu1 %v2375_v17  ;;  %v3495_v16 = vld [vmem:[#allocation29_spill] sm:$0xff]  ;;  %v3496_v17 = vld [vmem:[#allocation30_spill] sm:$0xff] }
 0x267   :  { %1013 = vmatpush1.msra.mxu0 %v2381_v18  ;;  %1084 = vmatpush1.msra.mxu1 %v2383_v19  ;;  %v3497_v18 = vld [vmem:[#allocation31_spill] sm:$0xff]  ;;  %v3498_v19 = vld [vmem:[#allocation32_spill] sm:$0xff] }
 0x268   :  { %1014 = vmatprep.subr.mxu0 %v2389_v21  ;;  %1085 = vmatprep.subr.mxu1 %v2391_v22  ;;  %v3499_v21 = vld [vmem:[#allocation33_spill] sm:$0xff]  ;;  %v3500_v22 = vld [vmem:[#allocation34_spill] sm:$0xff] }
 0x269   :  { %1015 = vmatpush1.msra.mxu0 %v2395_v23  ;;  %1086 = vmatpush1.msra.mxu1 %v2397_v24  ;;  %v3501_v23 = vld [vmem:[#allocation35_spill] sm:$0xff]  ;;  %v3502_v24 = vld [vmem:[#allocation36_spill] sm:$0xff] }
 0x26a   :  { %1016 = vmatprep.subr.mxu0 %v2399_v25  ;;  %1087 = vmatprep.subr.mxu1 %v2401_v26  ;;  %v3503_v25 = vmov 0.0   ;;  %v3504_v26 = vld [vmem:[#allocation37_spill] sm:$0xff] }
 0x26b   :  { %1017 = vmatpush1.msra.mxu0 %v2407_v27  ;;  %1088 = vmatpush1.msra.mxu1 %v2409_v28 }
 0x26c   :  { %1018 = vmatprep.subr.mxu0 %v2415_v30  ;;  %1089 = vmatprep.subr.mxu1 %v2417_v31 }
 0x26d   :  { %1019 = vmatpush1.msra.mxu0 %v2421_v32  ;;  %1090 = vmatpush1.msra.mxu1 %v2423_v33 }
 0x26e   :  { %1020 = vmatprep.subr.mxu0 %v2425_v34  ;;  %1091 = vmatprep.subr.mxu1 %v2427_v35 }
 0x26f   :  { %1021 = vmatpush1.msra.mxu0 %v2433_v36  ;;  %1092 = vmatpush1.msra.mxu1 %v2435_v37 }
 0x270   :  { %1022 = vmatprep.subr.mxu0 %v2441_v39  ;;  %1093 = vmatprep.subr.mxu1 %v2443_v40 }
 0x271   :  { %1023 = vmatpush1.msra.mxu0 %v2447_v41  ;;  %1094 = vmatpush1.msra.mxu1 %v2449_v42 }
 0x272   :  { %1024 = vmatprep.subr.mxu0 %v2451_v43  ;;  %1095 = vmatprep.subr.mxu1 %v2453_v44 }
 0x273   :  { %1025 = vmatpush1.msra.mxu0 %v2459_v45  ;;  %1096 = vmatpush1.msra.mxu1 %v2461_v46 }
 0x274   :  { %1026 = vmatprep.subr.mxu0 %v2467_v48  ;;  %1097 = vmatprep.subr.mxu1 %v2469_v49 }
 0x275   :  { %1027 = vmatpush1.msra.mxu0 %v2473_v50  ;;  %1098 = vmatpush1.msra.mxu1 %v2475_v51 }
 0x276   :  { %1028 = vmatprep.subr.mxu0 %v3458_v29  ;;  %1099 = vmatprep.subr.mxu1 %v3485_v5 }
 0x277   :  { %1029 = vmatpush1.msra.mxu0 %v3486_v6  ;;  %1100 = vmatpush1.msra.mxu1 %v3487_v7 }
 0x278   :  { %1030 = vmatprep.subr.mxu0 %v3488_v8  ;;  %1101 = vmatprep.subr.mxu1 %v3489_v9 }
 0x279   :  { %1031 = vmatpush1.msra.mxu0 %v3490_v10  ;;  %1102 = vmatpush1.msra.mxu1 %v3491_v12 }
 0x27a   :  { %1032 = vmatprep.subr.mxu0 %v3492_v13  ;;  %1103 = vmatprep.subr.mxu1 %v3493_v14 }
 0x27b   :  { %1033 = vmatpush1.msra.mxu0 %v3494_v15  ;;  %1104 = vmatpush1.msra.mxu1 %v3495_v16 }
 0x27c   :  { %1034 = vmatprep.subr.mxu0 %v3496_v17  ;;  %1105 = vmatprep.subr.mxu1 %v3497_v18 }
 0x27d   :  { %1035 = vmatpush1.msra.mxu0 %v3498_v19  ;;  %1106 = vmatpush1.msra.mxu1 %v3499_v21 }
 0x27e   :  { %1036 = vmatprep.subr.mxu0 %v3500_v22  ;;  %1107 = vmatprep.subr.mxu1 %v3501_v23 }
 0x27f   :  { %1037 = vmatpush1.msra.mxu0 %v3502_v24  ;;  %1070 = vmatprep.mubr.f32.mxu0 %v3503_v25 }
 0x280   :  { %1108 = vmatpush1.msra.mxu1 %v3504_v26  ;;  %1141 = vmatprep.mubr.f32.mxu1 %v3503_v25 }
 0x281   :  { %1175 = vmatprep.subr.mxu0 %v3505_v38  ;;  %1246 = vmatprep.subr.mxu1 %v3506_v47 }
 0x320   :  { %v903_v0 = vpop.f32.mrf.mxu0  ;;  %v974_v57 = vpop.f32.mrf.mxu1 }
 0x321   :  { %v979_v63 = vadd.f32 %v903_v0, %v3507_v3  ;;  %v981_v4 = vadd.f32 %v974_v57, %v3509_v54 }
 0x322   :  { %v905_v55 = vpop.f32.mrf.mxu0  ;;  %v976_v56 = vpop.f32.mrf.mxu1 }
 0x323   :  { %v983_v2 = vmul.f32 0.5, %v979_v63  ;;  %v980_v1 = vadd.f32 %v905_v55, %v3508_v60  ;;  %v982_v52 = vadd.f32 %v976_v56, %v3510_v58  ;;  %v2862_v56 = vld [vmem:[#allocation8 + $0x1f0] sm:$0xff]  ;;  %v2868_v58 = vld [vmem:[#allocation8 + $0x1d8] sm:$0xff] }
 0x325   :  { %2041 = vtanh.f32 %v983_v2  ;;  %v987_v59 = vmul.f32 0.5, %v980_v1  ;;  %v992_v61 = vmul.f32 0.5, %v982_v52  ;;  %v2871_v52 = vld [vmem:[#allocation8 + $0x1c0] sm:$0xff] }
 0x327   :  { %2043 = vtanh.f32 %v987_v59  ;;  %v2859_v59 = vld [vmem:[#allocation8 + $0x1e0] sm:$0xff] }
 0x328   :  { %2045 = vtanh.f32 %v981_v4 }
 0x329   :  { %2047 = vtanh.f32 %v992_v61  ;;  %v2874_v61 = vld [vmem:[#allocation8 + $0x1d0] sm:$0xff] }
 0x332   :  { %v2042_v20 = vpop.eup %2041 }
 0x333   :  { %v985_v62 = vmul.f32 0.5, %v2042_v20  ;;  %v2877_v20 = vld [vmem:[#allocation8 + $0x1a8] sm:$0xff] }
 0x334   :  { %v2044_v11 = vpop.eup %2043 }
 0x335   :  { %v986_v38 = vadd.f32 0.5, %v985_v62  ;;  %v989_v47 = vmul.f32 0.5, %v2044_v11  ;;  %v2046_v0 = vpop.eup %2045  ;;  %v2880_v62 = vld [vmem:[#allocation8 + $0x1b8] sm:$0xff]  ;;  %v2883_v11 = vld [vmem:[#allocation8 + $0x1a0] sm:$0xff] }
 0x336   :  { %v2048_v57 = vpop.eup %2047 }
 0x337   :  { %v990_v3 = vadd.f32 0.5, %v989_v47  ;;  %v997_v63 = vmul.f32 %v2046_v0, %v986_v38  ;;  %v994_v60 = vmul.f32 0.5, %v2048_v57  ;;  %v2886_v38 = vld [vmem:[#allocation8 + $0x1b0] sm:$0xff]  ;;  %v2889_v47 = vld [vmem:[#allocation8 + $0x188] sm:$0xff]  ;;  %v2892_v0 = vld [vmem:[#allocation8 + $0x198] sm:$0xff] }
 0x338   :  { %v2904_v57 = vld [vmem:[#allocation8 + $0x178] sm:$0xff] }
 0x339   :  { %v996_v55 = vmul.f32 %v990_v3, %v2782_v53  ;;  %v995_v1 = vadd.f32 0.5, %v994_v60  ;;  %v2865_v53 = vld [vmem:[#allocation8 + $0x1c8] sm:$0xff]  ;;  %v2895_v3 = vld [vmem:[#allocation8 + $0x180] sm:$0xff] }
 0x33a   :  { %v2907_v60 = vld [vmem:[#allocation8 + $0x160] sm:$0xff] }
 0x33b   :  { %v2856_v2 = vadd.f32 %v997_v63, %v996_v55  ;;  %v2898_v63 = vld [vmem:[#allocation8 + $0x190] sm:$0xff]  ;;  %v2901_v55 = vld [vmem:[#allocation8 + $0x168] sm:$0xff] }
 0x33d   :  { %2049 = vtanh.f32 %v2856_v2 }
 0x34a   :  { %v2050_v54 = vpop.eup %2049 }
 0x34b   :  { %v1000_v4 = vmul.f32 %v2050_v54, %v995_v1  ;;  %v2910_v1 = vld [vmem:[#allocation8 + $0x170] sm:$0xff]  ;;  %v2913_v54 = vld [vmem:[#allocation8 + $0x148] sm:$0xff] }
 0x34d   :  { %1071 = vmatmul.mubr.f32.vlgmr.msra.gmra.mxu0 %v1000_v4  ;;  %1142 = vmatmul.mubr.f32.vlgmr.msra.gmra.mxu1 %v1000_v4  ;;  %v2916_v4 = vld [vmem:[#allocation8 + $0x158] sm:$0xff] }
 0x34e   :  { %1176 = vmatpush1.msra.mxu0 %v2859_v59  ;;  %1247 = vmatpush1.msra.mxu1 %v2862_v56 }
 0x34f   :  { %1177 = vmatprep.subr.mxu0 %v2865_v53  ;;  %1248 = vmatprep.subr.mxu1 %v2868_v58 }
 0x350   :  { %1178 = vmatpush1.msra.mxu0 %v2871_v52  ;;  %1249 = vmatpush1.msra.mxu1 %v2874_v61 }
 0x351   :  { %1179 = vmatprep.subr.mxu0 %v2877_v20  ;;  %1250 = vmatprep.subr.mxu1 %v2880_v62 }
 0x352   :  { %1180 = vmatpush1.msra.mxu0 %v2883_v11  ;;  %1251 = vmatpush1.msra.mxu1 %v2886_v38 }
 0x353   :  { %1181 = vmatprep.subr.mxu0 %v2889_v47  ;;  %1252 = vmatprep.subr.mxu1 %v2892_v0 }
 0x354   :  { %1182 = vmatpush1.msra.mxu0 %v2895_v3  ;;  %1253 = vmatpush1.msra.mxu1 %v2898_v63 }
 0x355   :  { %1183 = vmatprep.subr.mxu0 %v2901_v55  ;;  %1254 = vmatprep.subr.mxu1 %v2904_v57 }
 0x356   :  { %1184 = vmatpush1.msra.mxu0 %v2907_v60  ;;  %1255 = vmatpush1.msra.mxu1 %v2910_v1 }
 0x357   :  { %1185 = vmatprep.subr.mxu0 %v2913_v54  ;;  %1256 = vmatprep.subr.mxu1 %v2916_v4 }
 0x358   :  { %1186 = vmatpush1.msra.mxu0 %v2407_v27  ;;  %1257 = vmatpush1.msra.mxu1 %v2409_v28  ;;  %v2963_v27 = vld [vmem:[#allocation8 + $0x1e8] sm:$0xff]  ;;  %v2966_v28 = vld [vmem:[#allocation8 + $0x1f8] sm:$0xff] }
 0x359   :  { %1187 = vmatprep.subr.mxu0 %v2415_v30  ;;  %1258 = vmatprep.subr.mxu1 %v2417_v31  ;;  %3511 = vst [vmem:[#allocation18_spill] sm:$0xff] %v2963_v27  ;;  %3512 = vst [vmem:[#allocation38_spill] sm:$0xff] %v2966_v28  ;;  %v3513_v31 = vld [vmem:[#allocation46_spill] sm:$0xff] }
 0x35a   :  { %1188 = vmatpush1.msra.mxu0 %v2421_v32  ;;  %1259 = vmatpush1.msra.mxu1 %v2423_v33 }
 0x35b   :  { %1189 = vmatprep.subr.mxu0 %v2425_v34  ;;  %1260 = vmatprep.subr.mxu1 %v2427_v35 }
 0x35c   :  { %1190 = vmatpush1.msra.mxu0 %v2433_v36  ;;  %1261 = vmatpush1.msra.mxu1 %v2435_v37  ;;  %v3514_v36 = vld [vmem:[#allocation48_spill] sm:$0xff] }
 0x35d   :  { %1191 = vmatprep.subr.mxu0 %v2441_v39  ;;  %1262 = vmatprep.subr.mxu1 %v2443_v40  ;;  %v3515_v39 = vld [vmem:[#allocation47_spill] sm:$0xff] }
 0x35e   :  { %1192 = vmatpush1.msra.mxu0 %v2447_v41  ;;  %1263 = vmatpush1.msra.mxu1 %v2449_v42 }
 0x35f   :  { %1193 = vmatprep.subr.mxu0 %v2451_v43  ;;  %1264 = vmatprep.subr.mxu1 %v2453_v44  ;;  %v3516_v43 = vld [vmem:[#allocation49_spill] sm:$0xff] }
 0x360   :  { %1194 = vmatpush1.msra.mxu0 %v2459_v45  ;;  %1265 = vmatpush1.msra.mxu1 %v2461_v46 }
 0x361   :  { %1195 = vmatprep.subr.mxu0 %v2467_v48  ;;  %1266 = vmatprep.subr.mxu1 %v2469_v49 }
 0x362   :  { %1196 = vmatpush1.msra.mxu0 %v2473_v50  ;;  %1267 = vmatpush1.msra.mxu1 %v2475_v51 }
 0x363   :  { %1197 = vmatprep.subr.mxu0 %v3458_v29  ;;  %1268 = vmatprep.subr.mxu1 %v3485_v5 }
 0x364   :  { %1198 = vmatpush1.msra.mxu0 %v3486_v6  ;;  %1269 = vmatpush1.msra.mxu1 %v3487_v7 }
 0x365   :  { %1199 = vmatprep.subr.mxu0 %v3488_v8  ;;  %1270 = vmatprep.subr.mxu1 %v3489_v9 }
 0x366   :  { %1200 = vmatpush1.msra.mxu0 %v3490_v10  ;;  %1271 = vmatpush1.msra.mxu1 %v3491_v12 }
 0x367   :  { %1201 = vmatprep.subr.mxu0 %v3492_v13  ;;  %1272 = vmatprep.subr.mxu1 %v3493_v14 }
 0x368   :  { %1202 = vmatpush1.msra.mxu0 %v3494_v15  ;;  %1273 = vmatpush1.msra.mxu1 %v3495_v16  ;;  %v2997_v15 = vld [vmem:[#allocation8 + $0x140] sm:$0xff]  ;;  %v3000_v16 = vld [vmem:[#allocation8 + $0x150] sm:$0xff] }
 0x369   :  { %1203 = vmatprep.subr.mxu0 %v3496_v17  ;;  %1274 = vmatprep.subr.mxu1 %v3497_v18  ;;  %v3003_v17 = vld [vmem:[#allocation8 + $0x128] sm:$0xff]  ;;  %v3006_v18 = vld [vmem:[#allocation8 + $0x138] sm:$0xff] }
 0x36a   :  { %1204 = vmatpush1.msra.mxu0 %v3498_v19  ;;  %1275 = vmatpush1.msra.mxu1 %v3499_v21  ;;  %v3009_v19 = vld [vmem:[#allocation8 + $0x120] sm:$0xff]  ;;  %v3012_v21 = vld [vmem:[#allocation8 + $0x130] sm:$0xff] }
 0x36b   :  { %1205 = vmatprep.subr.mxu0 %v3500_v22  ;;  %1276 = vmatprep.subr.mxu1 %v3501_v23  ;;  %v3015_v22 = vld [vmem:[#allocation8 + $0x108] sm:$0xff]  ;;  %v3018_v23 = vld [vmem:[#allocation8 + $0x118] sm:$0xff] }
 0x36c   :  { %1206 = vmatpush1.msra.mxu0 %v3502_v24  ;;  %1239 = vmatprep.mubr.f32.mxu0 %v3503_v25  ;;  %v3021_v24 = vld [vmem:[#allocation8 + $0x100] sm:$0xff] }
 0x36d   :  { %1277 = vmatpush1.msra.mxu1 %v3504_v26  ;;  %1310 = vmatprep.mubr.f32.mxu1 %v3503_v25  ;;  %v3024_v26 = vld [vmem:[#allocation8 + $0x110] sm:$0xff] }
 0x36e   :  { %1344 = vmatprep.subr.mxu0 %v2963_v27  ;;  %1415 = vmatprep.subr.mxu1 %v2966_v28 }
 0x40d   :  { %v1072_v30 = vpop.f32.mrf.mxu0  ;;  %v1143_v33 = vpop.f32.mrf.mxu1 }
 0x40e   :  { %v1148_v32 = vadd.f32 %v1072_v30, %v3513_v31  ;;  %v1150_v40 = vadd.f32 %v1143_v33, %v3515_v39  ;;  %v3030_v30 = vld [vmem:[#allocation8 + $0xf8] sm:$0xff]  ;;  %v3033_v31 = vld [vmem:[#allocation8 + $0xe0] sm:$0xff]  ;;  %v3039_v33 = vld [vmem:[#allocation8 + $0xc8] sm:$0xff] }
 0x40f   :  { %v1074_v34 = vpop.f32.mrf.mxu0  ;;  %v1145_v42 = vpop.f32.mrf.mxu1  ;;  %v3054_v39 = vld [vmem:[#allocation8 + $0xb8] sm:$0xff] }
 0x410   :  { %v1152_v35 = vmul.f32 0.5, %v1148_v32  ;;  %v1149_v37 = vadd.f32 %v1074_v34, %v3514_v36  ;;  %v1151_v44 = vadd.f32 %v1145_v42, %v3516_v43  ;;  %v3036_v32 = vld [vmem:[#allocation8 + $0xf0] sm:$0xff]  ;;  %v3042_v34 = vld [vmem:[#allocation8 + $0xd8] sm:$0xff]  ;;  %v3063_v42 = vld [vmem:[#allocation8 + $0x88] sm:$0xff] }
 0x411   :  { %v3048_v36 = vld [vmem:[#allocation8 + $0xd0] sm:$0xff]  ;;  %v3066_v43 = vld [vmem:[#allocation8 + $0x98] sm:$0xff] }
 0x412   :  { %2051 = vtanh.f32 %v1152_v35  ;;  %v1156_v41 = vmul.f32 0.5, %v1149_v37  ;;  %v1161_v45 = vmul.f32 0.5, %v1151_v44  ;;  %v3045_v35 = vld [vmem:[#allocation8 + $0xc0] sm:$0xff]  ;;  %v3051_v37 = vld [vmem:[#allocation8 + $0xa8] sm:$0xff]  ;;  %3517 = vst [vmem:[#allocation40_spill] sm:$0xff] %v3066_v43 }
 0x413   :  { %v3069_v44 = vld [vmem:[#allocation8 + $0x80] sm:$0xff] }
 0x414   :  { %2053 = vtanh.f32 %v1156_v41  ;;  %v3060_v41 = vld [vmem:[#allocation8 + $0xb0] sm:$0xff]  ;;  %3518 = vst [vmem:[#allocation39_spill] sm:$0xff] %v3069_v44 }
 0x415   :  { %2055 = vtanh.f32 %v1150_v40  ;;  %v3057_v40 = vld [vmem:[#allocation8 + $0xa0] sm:$0xff] }
 0x416   :  { %2057 = vtanh.f32 %v1161_v45  ;;  %v3072_v45 = vld [vmem:[#allocation8 + $0x90] sm:$0xff] }
 0x417   :  { %3519 = vst [vmem:[#allocation41_spill] sm:$0xff] %v3072_v45 }
 0x41f   :  { %v2052_v46 = vpop.eup %2051 }
 0x420   :  { %v1154_v48 = vmul.f32 0.5, %v2052_v46  ;;  %v3075_v46 = vld [vmem:[#allocation8 + $0x68] sm:$0xff] }
 0x421   :  { %v2054_v49 = vpop.eup %2053  ;;  %3520 = vst [vmem:[#allocation19_spill] sm:$0xff] %v3075_v46 }
 0x422   :  { %v1155_v50 = vadd.f32 0.5, %v1154_v48  ;;  %v1158_v51 = vmul.f32 0.5, %v2054_v49  ;;  %v2056_v29 = vpop.eup %2055  ;;  %v3078_v48 = vld [vmem:[#allocation8 + $0x78] sm:$0xff]  ;;  %v3081_v49 = vld [vmem:[#allocation8 + $0x60] sm:$0xff] }
 0x423   :  { %v2058_v9 = vpop.eup %2057  ;;  %3521 = vst [vmem:[#allocation20_spill] sm:$0xff] %v3078_v48  ;;  %3522 = vst [vmem:[#allocation21_spill] sm:$0xff] %v3081_v49 }
 0x424   :  { %v1159_v5 = vadd.f32 0.5, %v1158_v51  ;;  %v1166_v6 = vmul.f32 %v2056_v29, %v1155_v50  ;;  %v1163_v10 = vmul.f32 0.5, %v2058_v9  ;;  %v3084_v50 = vld [vmem:[#allocation8 + $0x70] sm:$0xff]  ;;  %v3087_v51 = vld [vmem:[#allocation8 + $0x48] sm:$0xff]  ;;  %v3090_v29 = vld [vmem:[#allocation8 + $0x58] sm:$0xff] }
 0x425   :  { %3523 = vst [vmem:[#allocation22_spill] sm:$0xff] %v3084_v50  ;;  %3524 = vst [vmem:[#allocation23_spill] sm:$0xff] %v3087_v51  ;;  %v3102_v9 = vld [vmem:[#allocation8 + $0x38] sm:$0xff] }
 0x426   :  { %v1165_v7 = vmul.f32 %v1159_v5, %v2856_v2  ;;  %v1164_v12 = vadd.f32 0.5, %v1163_v10  ;;  %v3027_v2 = vld [vmem:[#allocation8 + $0xe8] sm:$0xff]  ;;  %3525 = vst [vmem:[#allocation24_spill] sm:$0xff] %v3090_v29  ;;  %v3093_v5 = vld [vmem:[#allocation8 + $0x40] sm:$0xff]  ;;  %3529 = vst [vmem:[#allocation28_spill] sm:$0xff] %v3102_v9 }
 0x427   :  { %3526 = vst [vmem:[#allocation25_spill] sm:$0xff] %v3093_v5  ;;  %v3105_v10 = vld [vmem:[#allocation8 + $0x20] sm:$0xff] }
 0x428   :  { %v2974_v8 = vadd.f32 %v1166_v6, %v1165_v7  ;;  %v3096_v6 = vld [vmem:[#allocation8 + $0x50] sm:$0xff]  ;;  %v3099_v7 = vld [vmem:[#allocation8 + $0x28] sm:$0xff]  ;;  %3530 = vst [vmem:[#allocation29_spill] sm:$0xff] %v3105_v10 }
 0x429   :  { %3527 = vst [vmem:[#allocation26_spill] sm:$0xff] %v3096_v6  ;;  %3528 = vst [vmem:[#allocation27_spill] sm:$0xff] %v3099_v7 }
 0x42a   :  { %2059 = vtanh.f32 %v2974_v8 }
 0x437   :  { %v2060_v13 = vpop.eup %2059 }
 0x438   :  { %v1169_v14 = vmul.f32 %v2060_v13, %v1164_v12  ;;  %v3108_v12 = vld [vmem:[#allocation8 + $0x30] sm:$0xff]  ;;  %v3111_v13 = vld [vmem:[#allocation8 + $0x8] sm:$0xff] }
 0x439   :  { %3531 = vst [vmem:[#allocation30_spill] sm:$0xff] %v3108_v12  ;;  %3532 = vst [vmem:[#allocation31_spill] sm:$0xff] %v3111_v13 }
 0x43a   :  { %1240 = vmatmul.mubr.f32.vlgmr.msra.gmra.mxu0 %v1169_v14  ;;  %1311 = vmatmul.mubr.f32.vlgmr.msra.gmra.mxu1 %v1169_v14  ;;  %v3114_v14 = vld [vmem:[#allocation8 + $0x18] sm:$0xff] }
 0x43b   :  { %1345 = vmatpush1.msra.mxu0 %v2859_v59  ;;  %1416 = vmatpush1.msra.mxu1 %v2862_v56  ;;  %3533 = vst [vmem:[#allocation32_spill] sm:$0xff] %v3114_v14 }
 0x43c   :  { %1346 = vmatprep.subr.mxu0 %v2865_v53  ;;  %1417 = vmatprep.subr.mxu1 %v2868_v58 }
 0x43d   :  { %1347 = vmatpush1.msra.mxu0 %v2871_v52  ;;  %1418 = vmatpush1.msra.mxu1 %v2874_v61 }
 0x43e   :  { %1348 = vmatprep.subr.mxu0 %v2877_v20  ;;  %1419 = vmatprep.subr.mxu1 %v2880_v62 }
 0x43f   :  { %1349 = vmatpush1.msra.mxu0 %v2883_v11  ;;  %1420 = vmatpush1.msra.mxu1 %v2886_v38 }
 0x440   :  { %1350 = vmatprep.subr.mxu0 %v2889_v47  ;;  %1421 = vmatprep.subr.mxu1 %v2892_v0 }
 0x441   :  { %1351 = vmatpush1.msra.mxu0 %v2895_v3  ;;  %1422 = vmatpush1.msra.mxu1 %v2898_v63 }
 0x442   :  { %1352 = vmatprep.subr.mxu0 %v2901_v55  ;;  %1423 = vmatprep.subr.mxu1 %v2904_v57 }
 0x443   :  { %1353 = vmatpush1.msra.mxu0 %v2907_v60  ;;  %1424 = vmatpush1.msra.mxu1 %v2910_v1 }
 0x444   :  { %1354 = vmatprep.subr.mxu0 %v2913_v54  ;;  %1425 = vmatprep.subr.mxu1 %v2916_v4 }
 0x445   :  { %1355 = vmatpush1.msra.mxu0 %v2997_v15  ;;  %1426 = vmatpush1.msra.mxu1 %v3000_v16 }
 0x446   :  { %1356 = vmatprep.subr.mxu0 %v3003_v17  ;;  %1427 = vmatprep.subr.mxu1 %v3006_v18 }
 0x447   :  { %1357 = vmatpush1.msra.mxu0 %v3009_v19  ;;  %1428 = vmatpush1.msra.mxu1 %v3012_v21 }
 0x448   :  { %1358 = vmatprep.subr.mxu0 %v3015_v22  ;;  %1429 = vmatprep.subr.mxu1 %v3018_v23 }
 0x449   :  { %1359 = vmatpush1.msra.mxu0 %v3021_v24  ;;  %1430 = vmatpush1.msra.mxu1 %v3024_v26 }
 0x44a   :  { %1360 = vmatprep.subr.mxu0 %v3027_v2  ;;  %1431 = vmatprep.subr.mxu1 %v3030_v30 }
 0x44b   :  { %1361 = vmatpush1.msra.mxu0 %v3033_v31  ;;  %1432 = vmatpush1.msra.mxu1 %v3036_v32 }
 0x44c   :  { %1362 = vmatprep.subr.mxu0 %v3039_v33  ;;  %1433 = vmatprep.subr.mxu1 %v3042_v34 }
 0x44d   :  { %1363 = vmatpush1.msra.mxu0 %v3045_v35  ;;  %1434 = vmatpush1.msra.mxu1 %v3048_v36 }
 0x44e   :  { %1364 = vmatprep.subr.mxu0 %v3051_v37  ;;  %1435 = vmatprep.subr.mxu1 %v3054_v39 }
 0x44f   :  { %1365 = vmatpush1.msra.mxu0 %v3057_v40  ;;  %1436 = vmatpush1.msra.mxu1 %v3060_v41 }
 0x450   :  { %1366 = vmatprep.subr.mxu0 %v3063_v42  ;;  %1437 = vmatprep.subr.mxu1 %v3066_v43 }
 0x451   :  { %1367 = vmatpush1.msra.mxu0 %v3069_v44  ;;  %1438 = vmatpush1.msra.mxu1 %v3072_v45 }
 0x452   :  { %1368 = vmatprep.subr.mxu0 %v3075_v46  ;;  %1439 = vmatprep.subr.mxu1 %v3078_v48 }
 0x453   :  { %1369 = vmatpush1.msra.mxu0 %v3081_v49  ;;  %1440 = vmatpush1.msra.mxu1 %v3084_v50 }
 0x454   :  { %1370 = vmatprep.subr.mxu0 %v3087_v51  ;;  %1441 = vmatprep.subr.mxu1 %v3090_v29  ;;  %v3537_v29 = vld [vmem:[#allocation52_spill] sm:$0xff]  ;;  %v3538_v51 = vld [vmem:[#allocation51_spill] sm:$0xff] }
 0x455   :  { %1371 = vmatpush1.msra.mxu0 %v3093_v5  ;;  %1442 = vmatpush1.msra.mxu1 %v3096_v6 }
 0x456   :  { %1372 = vmatprep.subr.mxu0 %v3099_v7  ;;  %1443 = vmatprep.subr.mxu1 %v3102_v9  ;;  %v3117_v7 = vld [vmem:[#allocation8] sm:$0xff]  ;;  %v3121_v9 = vld [vmem:[#allocation8 + $0x10] sm:$0xff] }
 0x457   :  { %1373 = vmatpush1.msra.mxu0 %v3105_v10  ;;  %1444 = vmatpush1.msra.mxu1 %v3108_v12  ;;  %3534 = vst [vmem:[#allocation33_spill] sm:$0xff] %v3117_v7  ;;  %3535 = vst [vmem:[#allocation34_spill] sm:$0xff] %v3121_v9  ;;  %v3536_v12 = vld [vmem:[#allocation50_spill] sm:$0xff] }
 0x458   :  { %1374 = vmatprep.subr.mxu0 %v3111_v13  ;;  %1445 = vmatprep.subr.mxu1 %v3114_v14 }
 0x459   :  { %1375 = vmatpush1.msra.mxu0 %v3117_v7  ;;  %1408 = vmatprep.mubr.f32.mxu0 %v3503_v25 }
 0x45a   :  { %1446 = vmatpush1.msra.mxu1 %v3121_v9  ;;  %1479 = vmatprep.mubr.f32.mxu1 %v3503_v25  ;;  %v3539_v25 = vld [vmem:[#allocation53_spill] sm:$0xff] }
 0x45b   :  { %1513 = vmatprep.subr.mxu0 %v2963_v27  ;;  %1584 = vmatprep.subr.mxu1 %v2966_v28 }
 0x4fa   :  { %v1241_v13 = vpop.f32.mrf.mxu0  ;;  %v1312_v14 = vpop.f32.mrf.mxu1 }
 0x4fb   :  { %v1317_v10 = vadd.f32 %v1241_v13, %v3536_v12  ;;  %v1319_v50 = vadd.f32 %v1312_v14, %v3538_v51  ;;  %v3550_v14 = vld [vmem:[#allocation26_spill] sm:$0xff] }
 0x4fc   :  { %v1243_v6 = vpop.f32.mrf.mxu0  ;;  %v1314_v9 = vpop.f32.mrf.mxu1 }
 0x4fd   :  { %v1321_v5 = vmul.f32 0.5, %v1317_v10  ;;  %v1318_v7 = vadd.f32 %v1243_v6, %v3537_v29  ;;  %v1320_v48 = vadd.f32 %v1314_v9, %v3539_v25  ;;  %v3547_v6 = vld [vmem:[#allocation23_spill] sm:$0xff]  ;;  %v3549_v9 = vld [vmem:[#allocation25_spill] sm:$0xff] }
 0x4ff   :  { %2061 = vtanh.f32 %v1321_v5  ;;  %v1325_v49 = vmul.f32 0.5, %v1318_v7  ;;  %v1330_v27 = vmul.f32 0.5, %v1320_v48  ;;  %v3548_v7 = vld [vmem:[#allocation24_spill] sm:$0xff] }
 0x501   :  { %2063 = vtanh.f32 %v1325_v49 }
 0x502   :  { %2065 = vtanh.f32 %v1319_v50 }
 0x503   :  { %2067 = vtanh.f32 %v1330_v27  ;;  %v3540_v27 = vld [vmem:[#allocation40_spill] sm:$0xff] }
 0x50c   :  { %v2062_v46 = vpop.eup %2061 }
 0x50d   :  { %v1323_v28 = vmul.f32 0.5, %v2062_v46  ;;  %v3546_v46 = vld [vmem:[#allocation22_spill] sm:$0xff] }
 0x50e   :  { %v2064_v45 = vpop.eup %2063 }
 0x50f   :  { %v1324_v44 = vadd.f32 0.5, %v1323_v28  ;;  %v1327_v12 = vmul.f32 0.5, %v2064_v45  ;;  %v2066_v13 = vpop.eup %2065  ;;  %v3541_v28 = vld [vmem:[#allocation39_spill] sm:$0xff]  ;;  %v3545_v45 = vld [vmem:[#allocation21_spill] sm:$0xff] }
 0x510   :  { %v2068_v49 = vpop.eup %2067 }
 0x511   :  { %v1328_v10 = vadd.f32 0.5, %v1327_v12  ;;  %v1335_v43 = vmul.f32 %v2066_v13, %v1324_v44  ;;  %v1332_v50 = vmul.f32 0.5, %v2068_v49  ;;  %v3544_v44 = vld [vmem:[#allocation20_spill] sm:$0xff]  ;;  %v3551_v12 = vld [vmem:[#allocation27_spill] sm:$0xff] }
 0x512   :  { %v3552_v13 = vld [vmem:[#allocation28_spill] sm:$0xff]  ;;  %v3555_v49 = vld [vmem:[#allocation31_spill] sm:$0xff] }
 0x513   :  { %v1334_v29 = vmul.f32 %v1328_v10, %v2974_v8  ;;  %v1333_v51 = vadd.f32 0.5, %v1332_v50  ;;  %v3542_v8 = vld [vmem:[#allocation41_spill] sm:$0xff]  ;;  %v3556_v50 = vld [vmem:[#allocation32_spill] sm:$0xff] }
 0x514   :  { %v3553_v10 = vld [vmem:[#allocation29_spill] sm:$0xff] }
 0x515   :  { %v3132_v5 = vadd.f32 %v1335_v43, %v1334_v29  ;;  %v3543_v43 = vld [vmem:[#allocation19_spill] sm:$0xff]  ;;  %v3554_v29 = vld [vmem:[#allocation30_spill] sm:$0xff] }
 0x517   :  { %2069 = vtanh.f32 %v3132_v5 }
 0x524   :  { %v2070_v25 = vpop.eup %2069 }
 0x525   :  { %v1338_v48 = vmul.f32 %v2070_v25, %v1333_v51  ;;  %v3557_v51 = vld [vmem:[#allocation33_spill] sm:$0xff]  ;;  %v3558_v25 = vmov 0.0  }
 0x527   :  { %1409 = vmatmul.mubr.f32.vlgmr.msra.gmra.mxu0 %v1338_v48  ;;  %1480 = vmatmul.mubr.f32.vlgmr.msra.gmra.mxu1 %v1338_v48  ;;  %v3559_v48 = vld [vmem:[#allocation34_spill] sm:$0xff] }
 0x528   :  { %1514 = vmatpush1.msra.mxu0 %v2859_v59  ;;  %1585 = vmatpush1.msra.mxu1 %v2862_v56 }
 0x529   :  { %1515 = vmatprep.subr.mxu0 %v2865_v53  ;;  %1586 = vmatprep.subr.mxu1 %v2868_v58 }
 0x52a   :  { %1516 = vmatpush1.msra.mxu0 %v2871_v52  ;;  %1587 = vmatpush1.msra.mxu1 %v2874_v61 }
 0x52b   :  { %1517 = vmatprep.subr.mxu0 %v2877_v20  ;;  %1588 = vmatprep.subr.mxu1 %v2880_v62 }
 0x52c   :  { %1518 = vmatpush1.msra.mxu0 %v2883_v11  ;;  %1589 = vmatpush1.msra.mxu1 %v2886_v38 }
 0x52d   :  { %1519 = vmatprep.subr.mxu0 %v2889_v47  ;;  %1590 = vmatprep.subr.mxu1 %v2892_v0 }
 0x52e   :  { %1520 = vmatpush1.msra.mxu0 %v2895_v3  ;;  %1591 = vmatpush1.msra.mxu1 %v2898_v63 }
 0x52f   :  { %1521 = vmatprep.subr.mxu0 %v2901_v55  ;;  %1592 = vmatprep.subr.mxu1 %v2904_v57 }
 0x530   :  { %1522 = vmatpush1.msra.mxu0 %v2907_v60  ;;  %1593 = vmatpush1.msra.mxu1 %v2910_v1 }
 0x531   :  { %1523 = vmatprep.subr.mxu0 %v2913_v54  ;;  %1594 = vmatprep.subr.mxu1 %v2916_v4 }
 0x532   :  { %1524 = vmatpush1.msra.mxu0 %v2997_v15  ;;  %1595 = vmatpush1.msra.mxu1 %v3000_v16 }
 0x533   :  { %1525 = vmatprep.subr.mxu0 %v3003_v17  ;;  %1596 = vmatprep.subr.mxu1 %v3006_v18 }
 0x534   :  { %1526 = vmatpush1.msra.mxu0 %v3009_v19  ;;  %1597 = vmatpush1.msra.mxu1 %v3012_v21 }
 0x535   :  { %1527 = vmatprep.subr.mxu0 %v3015_v22  ;;  %1598 = vmatprep.subr.mxu1 %v3018_v23 }
 0x536   :  { %1528 = vmatpush1.msra.mxu0 %v3021_v24  ;;  %1599 = vmatpush1.msra.mxu1 %v3024_v26 }
 0x537   :  { %1529 = vmatprep.subr.mxu0 %v3027_v2  ;;  %1600 = vmatprep.subr.mxu1 %v3030_v30 }
 0x538   :  { %1530 = vmatpush1.msra.mxu0 %v3033_v31  ;;  %1601 = vmatpush1.msra.mxu1 %v3036_v32 }
 0x539   :  { %1531 = vmatprep.subr.mxu0 %v3039_v33  ;;  %1602 = vmatprep.subr.mxu1 %v3042_v34 }
 0x53a   :  { %1532 = vmatpush1.msra.mxu0 %v3045_v35  ;;  %1603 = vmatpush1.msra.mxu1 %v3048_v36 }
 0x53b   :  { %1533 = vmatprep.subr.mxu0 %v3051_v37  ;;  %1604 = vmatprep.subr.mxu1 %v3054_v39 }
 0x53c   :  { %1534 = vmatpush1.msra.mxu0 %v3057_v40  ;;  %1605 = vmatpush1.msra.mxu1 %v3060_v41 }
 0x53d   :  { %1535 = vmatprep.subr.mxu0 %v3063_v42  ;;  %1606 = vmatprep.subr.mxu1 %v3540_v27 }
 0x53e   :  { %1536 = vmatpush1.msra.mxu0 %v3541_v28  ;;  %1607 = vmatpush1.msra.mxu1 %v3542_v8 }
 0x53f   :  { %1537 = vmatprep.subr.mxu0 %v3543_v43  ;;  %1608 = vmatprep.subr.mxu1 %v3544_v44 }
 0x540   :  { %1538 = vmatpush1.msra.mxu0 %v3545_v45  ;;  %1609 = vmatpush1.msra.mxu1 %v3546_v46 }
 0x541   :  { %1539 = vmatprep.subr.mxu0 %v3547_v6  ;;  %1610 = vmatprep.subr.mxu1 %v3548_v7  ;;  %v3563_v6 = vld [vmem:[#allocation56_spill] sm:$0xff] }
 0x542   :  { %1540 = vmatpush1.msra.mxu0 %v3549_v9  ;;  %1611 = vmatpush1.msra.mxu1 %v3550_v14  ;;  %v3560_v14 = vld [vmem:[#allocation18_spill] sm:$0xff] }
 0x543   :  { %1541 = vmatprep.subr.mxu0 %v3551_v12  ;;  %1612 = vmatprep.subr.mxu1 %v3552_v13  ;;  %v3561_v12 = vld [vmem:[#allocation38_spill] sm:$0xff] }
 0x544   :  { %1542 = vmatpush1.msra.mxu0 %v3553_v10  ;;  %1613 = vmatpush1.msra.mxu1 %v3554_v29  ;;  %v3562_v10 = vld [vmem:[#allocation54_spill] sm:$0xff] }
 0x545   :  { %1543 = vmatprep.subr.mxu0 %v3555_v49  ;;  %1614 = vmatprep.subr.mxu1 %v3556_v50 }
 0x546   :  { %1544 = vmatpush1.msra.mxu0 %v3557_v51  ;;  %1577 = vmatprep.mubr.f32.mxu0 %v3558_v25  ;;  %v3564_v51 = vld [vmem:[#allocation55_spill] sm:$0xff] }
 0x547   :  { %1615 = vmatpush1.msra.mxu1 %v3559_v48  ;;  %1648 = vmatprep.mubr.f32.mxu1 %v3558_v25  ;;  %v3565_v25 = vld [vmem:[#allocation57_spill] sm:$0xff] }
 0x548   :  { %1682 = vmatprep.subr.mxu0 %v3560_v14  ;;  %1753 = vmatprep.subr.mxu1 %v3561_v12 }
 0x5e7   :  { %v1410_v13 = vpop.f32.mrf.mxu0  ;;  %v1481_v29 = vpop.f32.mrf.mxu1 }
 0x5e8   :  { %v1486_v9 = vadd.f32 %v1410_v13, %v3562_v10  ;;  %v1488_v46 = vadd.f32 %v1481_v29, %v3564_v51 }
 0x5e9   :  { %v1412_v7 = vpop.f32.mrf.mxu0  ;;  %v1483_v48 = vpop.f32.mrf.mxu1 }
 0x5ea   :  { %v1490_v49 = vmul.f32 0.5, %v1486_v9  ;;  %v1487_v50 = vadd.f32 %v1412_v7, %v3563_v6  ;;  %v1489_v44 = vadd.f32 %v1483_v48, %v3565_v25  ;;  %v1861_v25 = vld [vmem:[#allocation9 + $0x78] sm:$0xff]  ;;  %v1860_v48 = vld [vmem:[#allocation9 + $0x70] sm:$0xff] }
 0x5ec   :  { %2071 = vtanh.f32 %v1490_v49  ;;  %v1494_v45 = vmul.f32 0.5, %v1487_v50  ;;  %v1499_v14 = vmul.f32 0.5, %v1489_v44 }
 0x5ee   :  { %2073 = vtanh.f32 %v1494_v45 }
 0x5ef   :  { %2075 = vtanh.f32 %v1488_v46 }
 0x5f0   :  { %2077 = vtanh.f32 %v1499_v14  ;;  %v1859_v14 = vld [vmem:[#allocation9 + $0x68] sm:$0xff] }
 0x5f9   :  { %v2072_v43 = vpop.eup %2071 }
 0x5fa   :  { %v1492_v12 = vmul.f32 0.5, %v2072_v43 }
 0x5fb   :  { %v2074_v8 = vpop.eup %2073 }
 0x5fc   :  { %v1493_v28 = vadd.f32 0.5, %v1492_v12  ;;  %v1496_v13 = vmul.f32 0.5, %v2074_v8  ;;  %v2076_v10 = vpop.eup %2075  ;;  %v1858_v12 = vld [vmem:[#allocation9 + $0x60] sm:$0xff] }
 0x5fd   :  { %v2078_v45 = vpop.eup %2077 }
 0x5fe   :  { %v1497_v9 = vadd.f32 0.5, %v1496_v13  ;;  %v1504_v27 = vmul.f32 %v2076_v10, %v1493_v28  ;;  %v1501_v46 = vmul.f32 0.5, %v2078_v45  ;;  %v1857_v13 = vld [vmem:[#allocation9 + $0x58] sm:$0xff]  ;;  %v1856_v10 = vld [vmem:[#allocation9 + $0x50] sm:$0xff] }
 0x5ff   :  { %v1852_v45 = vld [vmem:[#allocation9 + $0x30] sm:$0xff] }
 0x600   :  { %v1503_v6 = vmul.f32 %v1497_v9, %v3132_v5  ;;  %v1502_v29 = vadd.f32 0.5, %v1501_v46  ;;  %v1855_v9 = vld [vmem:[#allocation9 + $0x48] sm:$0xff] }
 0x601   :  { %v1851_v46 = vld [vmem:[#allocation9 + $0x28] sm:$0xff] }
 0x602   :  { %v3206_v7 = vadd.f32 %v1504_v27, %v1503_v6  ;;  %v1854_v6 = vld [vmem:[#allocation9 + $0x40] sm:$0xff] }
 0x604   :  { %2079 = vtanh.f32 %v3206_v7 }
 0x611   :  { %v2080_v49 = vpop.eup %2079 }
 0x612   :  { %v1507_v44 = vmul.f32 %v2080_v49, %v1502_v29  ;;  %v1850_v29 = vld [vmem:[#allocation9 + $0x20] sm:$0xff]  ;;  %v1849_v49 = vld [vmem:[#allocation9 + $0x18] sm:$0xff] }
 0x614   :  { %1578 = vmatmul.mubr.f32.vlgmr.msra.gmra.mxu0 %v1507_v44  ;;  %1649 = vmatmul.mubr.f32.vlgmr.msra.gmra.mxu1 %v1507_v44  ;;  %v1848_v44 = vld [vmem:[#allocation9 + $0x10] sm:$0xff] }
 0x615   :  { %1683 = vmatpush1.msra.mxu0 %v2859_v59  ;;  %1754 = vmatpush1.msra.mxu1 %v2862_v56  ;;  %v3566_v59 = vld [vmem:[#allocation40_spill] sm:$0xff]  ;;  %v3567_v56 = vld [vmem:[#allocation39_spill] sm:$0xff] }
 0x616   :  { %1684 = vmatprep.subr.mxu0 %v2865_v53  ;;  %1755 = vmatprep.subr.mxu1 %v2868_v58  ;;  %v3568_v53 = vld [vmem:[#allocation41_spill] sm:$0xff]  ;;  %v3569_v58 = vld [vmem:[#allocation19_spill] sm:$0xff] }
 0x617   :  { %1685 = vmatpush1.msra.mxu0 %v2871_v52  ;;  %1756 = vmatpush1.msra.mxu1 %v2874_v61  ;;  %v3570_v52 = vld [vmem:[#allocation20_spill] sm:$0xff]  ;;  %v3571_v61 = vld [vmem:[#allocation21_spill] sm:$0xff] }
 0x618   :  { %1686 = vmatprep.subr.mxu0 %v2877_v20  ;;  %1757 = vmatprep.subr.mxu1 %v2880_v62  ;;  %v3572_v20 = vld [vmem:[#allocation22_spill] sm:$0xff]  ;;  %v3573_v62 = vld [vmem:[#allocation23_spill] sm:$0xff] }
 0x619   :  { %1687 = vmatpush1.msra.mxu0 %v2883_v11  ;;  %1758 = vmatpush1.msra.mxu1 %v2886_v38  ;;  %v3574_v11 = vld [vmem:[#allocation24_spill] sm:$0xff]  ;;  %v3575_v38 = vld [vmem:[#allocation25_spill] sm:$0xff] }
 0x61a   :  { %1688 = vmatprep.subr.mxu0 %v2889_v47  ;;  %1759 = vmatprep.subr.mxu1 %v2892_v0  ;;  %v3576_v47 = vld [vmem:[#allocation26_spill] sm:$0xff]  ;;  %v3577_v0 = vld [vmem:[#allocation27_spill] sm:$0xff] }
 0x61b   :  { %1689 = vmatpush1.msra.mxu0 %v2895_v3  ;;  %1760 = vmatpush1.msra.mxu1 %v2898_v63  ;;  %v3578_v3 = vld [vmem:[#allocation28_spill] sm:$0xff]  ;;  %v3579_v63 = vld [vmem:[#allocation29_spill] sm:$0xff] }
 0x61c   :  { %1690 = vmatprep.subr.mxu0 %v2901_v55  ;;  %1761 = vmatprep.subr.mxu1 %v2904_v57  ;;  %v3580_v55 = vld [vmem:[#allocation30_spill] sm:$0xff]  ;;  %v3581_v57 = vld [vmem:[#allocation31_spill] sm:$0xff] }
 0x61d   :  { %1691 = vmatpush1.msra.mxu0 %v2907_v60  ;;  %1762 = vmatpush1.msra.mxu1 %v2910_v1  ;;  %v3582_v60 = vld [vmem:[#allocation32_spill] sm:$0xff]  ;;  %v3583_v1 = vld [vmem:[#allocation33_spill] sm:$0xff] }
 0x61e   :  { %1692 = vmatprep.subr.mxu0 %v2913_v54  ;;  %1763 = vmatprep.subr.mxu1 %v2916_v4  ;;  %v3584_v54 = vmov 0.0   ;;  %v3585_v4 = vld [vmem:[#allocation34_spill] sm:$0xff] }
 0x61f   :  { %1693 = vmatpush1.msra.mxu0 %v2997_v15  ;;  %1764 = vmatpush1.msra.mxu1 %v3000_v16  ;;  %v3586_v16 = vld [vmem:[#allocation58_spill] sm:$0xff] }
 0x620   :  { %1694 = vmatprep.subr.mxu0 %v3003_v17  ;;  %1765 = vmatprep.subr.mxu1 %v3006_v18 }
 0x621   :  { %1695 = vmatpush1.msra.mxu0 %v3009_v19  ;;  %1766 = vmatpush1.msra.mxu1 %v3012_v21 }
 0x622   :  { %1696 = vmatprep.subr.mxu0 %v3015_v22  ;;  %1767 = vmatprep.subr.mxu1 %v3018_v23  ;;  %v3587_v22 = vld [vmem:[#allocation60_spill] sm:$0xff] }
 0x623   :  { %1697 = vmatpush1.msra.mxu0 %v3021_v24  ;;  %1768 = vmatpush1.msra.mxu1 %v3024_v26  ;;  %v3588_v24 = vld [vmem:[#allocation59_spill] sm:$0xff] }
 0x624   :  { %1698 = vmatprep.subr.mxu0 %v3027_v2  ;;  %1769 = vmatprep.subr.mxu1 %v3030_v30 }
 0x625   :  { %1699 = vmatpush1.msra.mxu0 %v3033_v31  ;;  %1770 = vmatpush1.msra.mxu1 %v3036_v32  ;;  %v3589_v31 = vld [vmem:[#allocation61_spill] sm:$0xff] }
 0x626   :  { %1700 = vmatprep.subr.mxu0 %v3039_v33  ;;  %1771 = vmatprep.subr.mxu1 %v3042_v34 }
 0x627   :  { %1701 = vmatpush1.msra.mxu0 %v3045_v35  ;;  %1772 = vmatpush1.msra.mxu1 %v3048_v36 }
 0x628   :  { %1702 = vmatprep.subr.mxu0 %v3051_v37  ;;  %1773 = vmatprep.subr.mxu1 %v3054_v39 }
 0x629   :  { %1703 = vmatpush1.msra.mxu0 %v3057_v40  ;;  %1774 = vmatpush1.msra.mxu1 %v3060_v41 }
 0x62a   :  { %1704 = vmatprep.subr.mxu0 %v3063_v42  ;;  %1775 = vmatprep.subr.mxu1 %v3566_v59  ;;  %v1847_v59 = vld [vmem:[#allocation9 + $0x8] sm:$0xff] }
 0x62b   :  { %1705 = vmatpush1.msra.mxu0 %v3567_v56  ;;  %1776 = vmatpush1.msra.mxu1 %v3568_v53  ;;  %v1846_v56 = vld [vmem:[#allocation9] sm:$0xff] }
 0x62c   :  { %1706 = vmatprep.subr.mxu0 %v3569_v58  ;;  %1777 = vmatprep.subr.mxu1 %v3570_v52  ;;  %v3590_v58 = vld [vmem:[#allocation62_spill] sm:$0xff] }
 0x62d   :  { %1707 = vmatpush1.msra.mxu0 %v3571_v61  ;;  %1778 = vmatpush1.msra.mxu1 %v3572_v20 }
 0x62e   :  { %1708 = vmatprep.subr.mxu0 %v3573_v62  ;;  %1779 = vmatprep.subr.mxu1 %v3574_v11  ;;  %v3591_v11 = vld [vmem:[#allocation64_spill] sm:$0xff] }
 0x62f   :  { %1709 = vmatpush1.msra.mxu0 %v3575_v38  ;;  %1780 = vmatpush1.msra.mxu1 %v3576_v47  ;;  %v3592_v47 = vld [vmem:[#allocation63_spill] sm:$0xff] }
 0x630   :  { %1710 = vmatprep.subr.mxu0 %v3577_v0  ;;  %1781 = vmatprep.subr.mxu1 %v3578_v3 }
 0x631   :  { %1711 = vmatpush1.msra.mxu0 %v3579_v63  ;;  %1782 = vmatpush1.msra.mxu1 %v3580_v55  ;;  %v3593_v55 = vld [vmem:[#allocation65_spill] sm:$0xff] }
 0x632   :  { %1712 = vmatprep.subr.mxu0 %v3581_v57  ;;  %1783 = vmatprep.subr.mxu1 %v3582_v60 }
 0x633   :  { %1713 = vmatpush1.msra.mxu0 %v3583_v1  ;;  %1746 = vmatprep.mubr.f32.mxu0 %v3584_v54 }
 0x634   :  { %1784 = vmatpush1.msra.mxu1 %v3585_v4  ;;  %1817 = vmatprep.mubr.f32.mxu1 %v3584_v54 }
 0x635   :  { %1975 = vmatprep.subr.mxu0 %v3584_v54 }
 0x6d4   :  { %v1579_v15 = vpop.f32.mrf.mxu0  ;;  %v1650_v18 = vpop.f32.mrf.mxu1 }
 0x6d5   :  { %v1655_v17 = vadd.f32 %v1579_v15, %v3586_v16  ;;  %v1657_v26 = vadd.f32 %v1650_v18, %v3588_v24 }
 0x6d6   :  { %v1581_v19 = vpop.f32.mrf.mxu0  ;;  %v1652_v30 = vpop.f32.mrf.mxu1 }
 0x6d7   :  { %v1659_v21 = vmul.f32 0.5, %v1655_v17  ;;  %v1656_v23 = vadd.f32 %v1581_v19, %v3587_v22  ;;  %v1658_v32 = vadd.f32 %v1652_v30, %v3589_v31  ;;  %v1957_v31 = vld [vmem:[%s3314_s5] ss:$0 sm:$0xff] }
 0x6d9   :  { %2081 = vtanh.f32 %v1659_v21  ;;  %v1663_v2 = vmul.f32 0.5, %v1656_v23  ;;  %v1668_v33 = vmul.f32 0.5, %v1658_v32 }
 0x6db   :  { %2083 = vtanh.f32 %v1663_v2 }
 0x6dc   :  { %2085 = vtanh.f32 %v1657_v26 }
 0x6dd   :  { %2087 = vtanh.f32 %v1668_v33 }
 0x6e6   :  { %v2082_v34 = vpop.eup %2081 }
 0x6e7   :  { %v1661_v35 = vmul.f32 0.5, %v2082_v34 }
 0x6e8   :  { %v2084_v36 = vpop.eup %2083 }
 0x6e9   :  { %v1662_v37 = vadd.f32 0.5, %v1661_v35  ;;  %v1665_v39 = vmul.f32 0.5, %v2084_v36  ;;  %v2086_v40 = vpop.eup %2085 }
 0x6ea   :  { %v2088_v28 = vpop.eup %2087 }
 0x6eb   :  { %v1666_v41 = vadd.f32 0.5, %v1665_v39  ;;  %v1673_v42 = vmul.f32 %v2086_v40, %v1662_v37  ;;  %v1670_v8 = vmul.f32 0.5, %v2088_v28 }
 0x6ed   :  { %v1672_v5 = vmul.f32 %v1666_v41, %v3206_v7  ;;  %v1671_v43 = vadd.f32 0.5, %v1670_v8  ;;  %v1853_v7 = vld [vmem:[#allocation9 + $0x38] sm:$0xff] }
 0x6ef   :  { %v3279_v27 = vadd.f32 %v1673_v42, %v1672_v5 }
 0x6f1   :  { %2089 = vtanh.f32 %v3279_v27 }
 0x6fe   :  { %v2090_v50 = vpop.eup %2089 }
 0x6ff   :  { %v1676_v51 = vmul.f32 %v2090_v50, %v1671_v43 }
 0x701   :  { %1747 = vmatmul.mubr.f32.vlgmr.msra.gmra.mxu0 %v1676_v51  ;;  %1818 = vmatmul.mubr.f32.vlgmr.msra.gmra.mxu1 %v1676_v51 }
 0x702   :  { %1976 = vmatpush3.msra.mxu0 %v1861_v25  ;;  %2007 = vmatprep.mubr.msk.f32.mxu0 %vm2282_vm0, %v3584_v54 }
 0x703   :  { %1977 = vmatprep.subr.mxu0 %v3584_v54 }
 0x704   :  { %1978 = vmatpush3.msra.mxu0 %v1860_v48 }
 0x705   :  { %1979 = vmatprep.subr.mxu0 %v3584_v54 }
 0x706   :  { %1980 = vmatpush3.msra.mxu0 %v1859_v14 }
 0x707   :  { %1981 = vmatprep.subr.mxu0 %v3584_v54 }
 0x708   :  { %1982 = vmatpush3.msra.mxu0 %v1858_v12 }
 0x709   :  { %1983 = vmatprep.subr.mxu0 %v3584_v54 }
 0x70a   :  { %1984 = vmatpush3.msra.mxu0 %v1857_v13 }
 0x70b   :  { %1985 = vmatprep.subr.mxu0 %v3584_v54 }
 0x70c   :  { %1986 = vmatpush3.msra.mxu0 %v1856_v10 }
 0x70d   :  { %1987 = vmatprep.subr.mxu0 %v3584_v54 }
 0x70e   :  { %1988 = vmatpush3.msra.mxu0 %v1855_v9 }
 0x70f   :  { %1989 = vmatprep.subr.mxu0 %v3584_v54 }
 0x710   :  { %1990 = vmatpush3.msra.mxu0 %v1854_v6 }
 0x711   :  { %1991 = vmatprep.subr.mxu0 %v3584_v54 }
 0x712   :  { %1992 = vmatpush3.msra.mxu0 %v1853_v7 }
 0x713   :  { %1993 = vmatprep.subr.mxu0 %v3584_v54 }
 0x714   :  { %1994 = vmatpush3.msra.mxu0 %v1852_v45 }
 0x715   :  { %1995 = vmatprep.subr.mxu0 %v3584_v54 }
 0x716   :  { %1996 = vmatpush3.msra.mxu0 %v1851_v46 }
 0x717   :  { %1997 = vmatprep.subr.mxu0 %v3584_v54 }
 0x718   :  { %1998 = vmatpush3.msra.mxu0 %v1850_v29 }
 0x719   :  { %1999 = vmatprep.subr.mxu0 %v3584_v54 }
 0x71a   :  { %2000 = vmatpush3.msra.mxu0 %v1849_v49 }
 0x71b   :  { %2001 = vmatprep.subr.mxu0 %v3584_v54 }
 0x71c   :  { %2002 = vmatpush3.msra.mxu0 %v1848_v44 }
 0x71d   :  { %2003 = vmatprep.subr.mxu0 %v3584_v54 }
 0x71e   :  { %2004 = vmatpush3.msra.mxu0 %v1847_v59 }
 0x71f   :  { %2005 = vmatprep.subr.mxu0 %v3584_v54 }
 0x720   :  { %2006 = vmatpush3.msra.mxu0 %v1846_v56 }
 0x7c1   :  { %v1748_v53 = vpop.f32.mrf.mxu0  ;;  %v1819_v61 = vpop.f32.mrf.mxu1 }
 0x7c2   :  { %v1824_v52 = vadd.f32 %v1748_v53, %v3590_v58  ;;  %v1826_v0 = vadd.f32 %v1819_v61, %v3592_v47 }
 0x7c3   :  { %v1750_v20 = vpop.f32.mrf.mxu0  ;;  %v1821_v63 = vpop.f32.mrf.mxu1 }
 0x7c4   :  { %v1828_v62 = vmul.f32 0.5, %v1824_v52  ;;  %v1825_v38 = vadd.f32 %v1750_v20, %v3591_v11  ;;  %v1827_v57 = vadd.f32 %v1821_v63, %v3593_v55 }
 0x7c6   :  { %2091 = vtanh.f32 %v1828_v62  ;;  %v1832_v3 = vmul.f32 0.5, %v1825_v38  ;;  %v1837_v60 = vmul.f32 0.5, %v1827_v57 }
 0x7c8   :  { %2093 = vtanh.f32 %v1832_v3 }
 0x7c9   :  { %2095 = vtanh.f32 %v1826_v0 }
 0x7ca   :  { %2097 = vtanh.f32 %v1837_v60 }
 0x7d3   :  { %v2092_v1 = vpop.eup %2091 }
 0x7d4   :  { %v1830_v54 = vmul.f32 0.5, %v2092_v1 }
 0x7d5   :  { %v2094_v4 = vpop.eup %2093 }
 0x7d6   :  { %v1831_v15 = vadd.f32 0.5, %v1830_v54  ;;  %v1834_v16 = vmul.f32 0.5, %v2094_v4  ;;  %v2096_v17 = vpop.eup %2095 }
 0x7d7   :  { %v2098_v23 = vpop.eup %2097 }
 0x7d8   :  { %v1835_v18 = vadd.f32 0.5, %v1834_v16  ;;  %v1842_v19 = vmul.f32 %v2096_v17, %v1831_v15  ;;  %v1839_v24 = vmul.f32 0.5, %v2098_v23 }
 0x7da   :  { %v1841_v21 = vmul.f32 %v1835_v18, %v3279_v27  ;;  %v1840_v26 = vadd.f32 0.5, %v1839_v24 }
 0x7dc   :  { %v1843_v22 = vadd.f32 %v1842_v19, %v1841_v21 }
 0x7de   :  { %2099 = vtanh.f32 %v1843_v22 }
 0x7eb   :  { %v2100_v2 = vpop.eup %2099 }
 0x7ec   :  { %v1845_v30 = vmul.f32 %v2100_v2, %v1840_v26 }
 0x7ee   :  { %2008 = vmatmul.mubr.f32.vlgmr.msra.gmra.mxu0 %v1845_v30 }
 0x8ae   :  { %v1935_v32 = vpop.f32.mrf.mxu0 }
 0x8af   :  { %v1936_v33 = vadd.f32 %v1957_v31, %v1935_v32 }
 0x8b0   :  { %v2009_v34 = vpop.f32.mrf.mxu0 }
 0x8b1   :  { %1939 = vst [vmem:[#allocation11] sm:$0xff] %v1936_v33 }
 0x8b2   :  { %2256 = shalt.err (!%p2253_p10)
}
 0x8b3   :  { %1949 = dma.vmem_to_hbm [thread:$0]  %s1947_s21, 128, %s3315_s6, [#allocation5]  }
 0x8b4   :  { %2271 = dma.done.wait [#allocation5], 128  }
 0x8b5   :  { %2272 = vsyncadd [#allocation5], 4294967168 }
 0x8b6   :  { %1953 = vsyncpa [#allocation4], 1 }
 0x8b7   :  { %1954 = vsyncpa [#allocation7], 1 }
 0x8b8   :  { %1955 = vsyncpa [#allocation10], 1 }
 0x8b9   :  { %1956 = vsyncpa [#allocation5], 1 }

</bundles_post_ra>
